<compile_context>
chip_gen: v6e
topology: v6e:2x2x1
jax: 0.10.0
libtpu: 0.0.40
codegen_flags: <defaults>
</compile_context>

<pallas_src>
import jax
import jax.numpy as jnp
from jax.experimental import pallas as pl
from jax.experimental.pallas import tpu as pltpu

D_MODEL = 32
NHEAD = 4
HEAD_DIM = D_MODEL // NHEAD
PACK = 4                    # batch elements packed along the lane axis (PACK*C = 128)
LN_EPS = 1e-5               # torch.nn.LayerNorm default eps
ATTN_EPS = 1e-6             # LoFTR LinearAttention eps


def _elu_feature_map(x):
    # elu(x) + 1  ==  x + 1 (x > 0), exp(x) (x <= 0)
    return jnp.where(x > 0, x + 1.0, jnp.exp(x))


def msa_kernel(x_ref, wq_ref, wk_ref, wv_ref, wm_ref, w1a_ref, w1b_ref, w2_ref,
               mask_ref, lnavg_ref, g1_ref, b1_ref, g2_ref, b2_ref, o_ref):
    """One grid step processes PACK batch elements packed along the lane axis.

    x_ref block : [1, L, PACK*C] f32   (lane-dense: PACK*C == 128)
    weights     : block-diagonally replicated (PACK copies), bf16
    mask_ref    : 0/1 block-diagonal per-(batch, head) mask [PACK*C, PACK*C]
    lnavg_ref   : per-batch channel-averaging matrix (1/C inside each batch block)
    """
    f32 = jnp.float32
    bf16 = jnp.bfloat16

    x = x_ref[0]                                   # [L, PC] f32
    L = x.shape[0]
    xb = x.astype(bf16)
    mask = mask_ref[...]                           # bf16 0/1
    lnavg = lnavg_ref[...]                         # bf16

    # ---- fused q/k/v projections (bf16 MXU operands, f32 accumulation) ----
    q = jnp.dot(xb, wq_ref[...], preferred_element_type=f32)
    k = jnp.dot(xb, wk_ref[...], preferred_element_type=f32)
    v = jnp.dot(xb, wv_ref[...], preferred_element_type=f32) * f32(1.0 / L)

    Q = _elu_feature_map(q)                        # [L, PC] f32
    K = _elu_feature_map(k)

    # ---- linear attention, all heads / packed batches at once ----
    # KV = K^T V (single XLU transpose), masked to per-(batch, head) diagonal blocks.
    kv = jax.lax.dot_general(K.astype(bf16), v.astype(bf16),
                             (((0,), (0,)), ((), ())),
                             preferred_element_type=f32)       # [PC, PC]
    kvb = kv.astype(bf16) * mask

    # Z normalizer for all heads at once: (Q * K.sum(0)) @ mask computes each head's
    # denominator and broadcasts it across that head's lanes.
    ksum = jnp.sum(K, axis=0, keepdims=True)                   # [1, PC]
    denom = jnp.dot((Q * ksum).astype(bf16), mask,
                    preferred_element_type=f32)                # [L, PC]
    z = 1.0 / (denom + ATTN_EPS)

    o = jnp.dot(Q.astype(bf16), kvb, preferred_element_type=f32) * (z * f32(L))
    merged = jnp.dot(o.astype(bf16), wm_ref[...], preferred_element_type=f32)

    # ---- LayerNorm over each batch's C channels via block-averaging matmuls ----
    def layer_norm(t, gamma, beta):
        mu = jnp.dot(t.astype(bf16), lnavg, preferred_element_type=f32)
        d = t - mu
        var = jnp.dot((d * d).astype(bf16), lnavg, preferred_element_type=f32)
        return d * jax.lax.rsqrt(var + LN_EPS) * gamma + beta

    n1 = layer_norm(merged, g1_ref[...], b1_ref[...])

    # ---- MLP on concat([x, n1]) expressed as split-weight matmuls ----
    h1 = jnp.maximum(
        jnp.dot(xb, w1a_ref[...], preferred_element_type=f32)
        + jnp.dot(n1.astype(bf16), w1b_ref[...], preferred_element_type=f32),
        0.0)                                                   # [L, PACK*2C]
    h2 = jnp.dot(h1.astype(bf16), w2_ref[...], preferred_element_type=f32)

    # ---- LayerNorm2 + residual ----
    n2 = layer_norm(h2, g2_ref[...], b2_ref[...])
    o_ref[0] = (x + n2).astype(o_ref.dtype)


def _rep_block_diag(w, p):
    """Block-diagonally replicate a 2-D weight p times: [a, b] -> [p*a, p*b]."""
    return jnp.kron(jnp.eye(p, dtype=w.dtype), w)


def pack_params(flat_params, pack=PACK):
    """One-time glue: replicate weights block-diagonally across the packed batch
    lanes, pre-cast MXU operands to bf16, build head / LayerNorm masks."""
    wq_t, wk_t, wv_t, wm_t, w1_t, w2_t, g1, b1, g2, b2 = flat_params
    C = wq_t.shape[0]
    bf16 = jnp.bfloat16

    w1a, w1b = w1_t[:C], w1_t[C:]                  # concat([x, n1]) -> split weights
    rep = lambda w: _rep_block_diag(w, pack).astype(bf16)
    wq_p, wk_p, wv_p, wm_p = rep(wq_t), rep(wk_t), rep(wv_t), rep(wm_t)
    w1a_p, w1b_p, w2_p = rep(w1a), rep(w1b), rep(w2_t)

    hd = C // NHEAD
    mask_bh = jnp.kron(jnp.eye(pack * NHEAD, dtype=jnp.float32),
                       jnp.ones((hd, hd), jnp.float32)).astype(bf16)
    lnavg = (jnp.kron(jnp.eye(pack, dtype=jnp.float32),
                      jnp.ones((C, C), jnp.float32)) / C).astype(bf16)

    tile = lambda g: jnp.tile(g, (1, pack)).astype(jnp.float32)
    return (wq_p, wk_p, wv_p, wm_p, w1a_p, w1b_p, w2_p,
            mask_bh, lnavg, tile(g1), tile(b1), tile(g2), tile(b2))


def msa_layer(features, packed_params, *, pack=PACK):
    """features: [N, L, C] float32 -> [N, L, C] float32."""
    N, L, C = features.shape
    PC = pack * C
    G = -(-N // pack)

    # Pad batch to a multiple of `pack`, then pack batch elements along lanes.
    if G * pack != N:
        features = jnp.concatenate(
            [features, jnp.zeros((G * pack - N, L, C), features.dtype)], axis=0)
    xp = features.reshape(G, pack, L, C).transpose(0, 2, 1, 3).reshape(G, L, PC)

    def full_spec(arr):
        return pl.BlockSpec(arr.shape, lambda g, _nd=arr.ndim: (0,) * _nd)

    grid_spec = pltpu.PrefetchScalarGridSpec(
        num_scalar_prefetch=0,
        grid=(G,),
        in_specs=[pl.BlockSpec((1, L, PC), lambda g: (g, 0, 0))]
                 + [full_spec(p) for p in packed_params],
        out_specs=pl.BlockSpec((1, L, PC), lambda g: (g, 0, 0)),
    )
    # TODO(synk): at real LoFTR sizes (L in the thousands, C=256) tile L as a second
    # grid axis and set vmem_limit_bytes explicitly (v7x has half the VMEM of v6e).
    out_p = pl.pallas_call(
        msa_kernel,
        out_shape=jax.ShapeDtypeStruct((G, L, PC), jnp.float32),
        grid_spec=grid_spec,
        compiler_params=pltpu.CompilerParams(dimension_semantics=("parallel",)),
    )(xp, *packed_params)

    out = out_p.reshape(G, L, pack, C).transpose(0, 2, 1, 3).reshape(G * pack, L, C)
    return out[:N]


def make_params(key):
    """Deterministic synthetic parameters (already transposed to (in, out))."""
    ks = jax.random.split(key, 8)
    C = D_MODEL
    s = 1.0 / jnp.sqrt(jnp.float32(C))
    wq_t = jax.random.normal(ks[0], (C, C), jnp.float32) * s
    wk_t = jax.random.normal(ks[1], (C, C), jnp.float32) * s
    wv_t = jax.random.normal(ks[2], (C, C), jnp.float32) * s
    wm_t = jax.random.normal(ks[3], (C, C), jnp.float32) * s
    w1_t = jax.random.normal(ks[4], (2 * C, 2 * C), jnp.float32) * (s / jnp.sqrt(2.0))
    w2_t = jax.random.normal(ks[5], (2 * C, C), jnp.float32) * (s / jnp.sqrt(2.0))
    g1 = 1.0 + 0.1 * jax.random.normal(ks[6], (1, C), jnp.float32)
    b1 = 0.1 * jax.random.normal(ks[7], (1, C), jnp.float32)
    g2 = jnp.ones((1, C), jnp.float32)
    b2 = jnp.zeros((1, C), jnp.float32)
    return (wq_t, wk_t, wv_t, wm_t, w1_t, w2_t, g1, b1, g2, b2)


def msa_reference(x, flat_params):
    """Pure-JAX f32 reference mirroring the PyTorch forward / LoFTR LinearAttention."""
    wq_t, wk_t, wv_t, wm_t, w1_t, w2_t, g1, b1, g2, b2 = flat_params
    N, L, C = x.shape
    q = (x @ wq_t).reshape(N, L, NHEAD, HEAD_DIM)
    k = (x @ wk_t).reshape(N, L, NHEAD, HEAD_DIM)
    v = (x @ wv_t).reshape(N, L, NHEAD, HEAD_DIM)
    Q = _elu_feature_map(q)
    K = _elu_feature_map(k)
    v_len = L
    V = v / v_len
    KV = jnp.einsum("nshd,nshv->nhdv", K, V)
    Z = 1.0 / (jnp.einsum("nlhd,nhd->nlh", Q, K.sum(axis=1)) + ATTN_EPS)
    msg = jnp.einsum("nlhd,nhdv,nlh->nlhv", Q, KV, Z) * v_len
    msg = msg.reshape(N, L, C) @ wm_t

    def ln(t, g, b):
        mu = t.mean(-1, keepdims=True)
        var = ((t - mu) ** 2).mean(-1, keepdims=True)
        return (t - mu) / jnp.sqrt(var + LN_EPS) * g + b

    n1 = ln(msg, g1, b1)
    cat = jnp.concatenate([x, n1], axis=-1)
    h = jnp.maximum(cat @ w1_t, 0.0) @ w2_t
    n2 = ln(h, g2, b2)
    return x + n2


if __name__ == "__main__":
    key = jax.random.PRNGKey(0)
    k_x, k_p = jax.random.split(key)

    N, L, C = 8, 64, D_MODEL       # N = 2 * PACK -> grid of 2 parallel steps
    features = jax.random.normal(k_x, (N, L, C), jnp.float32)
    flat_params = make_params(k_p)
    kernel_params = pack_params(flat_params, PACK)

    out = msa_layer(features, kernel_params, pack=PACK)
    out = jax.block_until_ready(out)

    ref = msa_reference(features, flat_params)
    assert out.shape == (N, L, C)
    max_err = float(jnp.max(jnp.abs(out - ref)))
    # bf16 MXU operands (f32 accumulation) -> loosened tolerance vs. the f32 reference.
    assert jnp.allclose(out, ref, atol=5e-2, rtol=5e-2), \
        f"kernel/reference mismatch (max abs err = {max_err})"

    print("KERNEL_OK")
</pallas_src>

<mosaic_0001>
module attributes {stable_mosaic.version = 11 : i64} {
  func.func @msa_kernel(%arg0: i32, %arg1: memref<1x64x128xf32, #tpu.memory_space<vmem>>, %arg2: memref<128x128xbf16, #tpu.memory_space<vmem>>, %arg3: memref<128x128xbf16, #tpu.memory_space<vmem>>, %arg4: memref<128x128xbf16, #tpu.memory_space<vmem>>, %arg5: memref<128x128xbf16, #tpu.memory_space<vmem>>, %arg6: memref<128x256xbf16, #tpu.memory_space<vmem>>, %arg7: memref<128x256xbf16, #tpu.memory_space<vmem>>, %arg8: memref<256x128xbf16, #tpu.memory_space<vmem>>, %arg9: memref<128x128xbf16, #tpu.memory_space<vmem>>, %arg10: memref<128x128xbf16, #tpu.memory_space<vmem>>, %arg11: memref<1x128xf32, #tpu.memory_space<vmem>>, %arg12: memref<1x128xf32, #tpu.memory_space<vmem>>, %arg13: memref<1x128xf32, #tpu.memory_space<vmem>>, %arg14: memref<1x128xf32, #tpu.memory_space<vmem>>, %arg15: memref<1x64x128xf32, #tpu.memory_space<vmem>>) attributes {dimension_semantics = [#tpu.dimension_semantics<parallel>], iteration_bounds = array<i64: 2>, scalar_prefetch = 0 : i64, scratch_operands = 0 : i64, tpu.core_type = #tpu.core_type<tc>, window_params = [{transform_indices = @transform_0, window_bounds = array<i64: 1, 64, 128>}, {pipeline_mode = #tpu.pipeline_mode<synchronous>, transform_indices = @transform_1, window_bounds = array<i64: 128, 128>}, {pipeline_mode = #tpu.pipeline_mode<synchronous>, transform_indices = @transform_2, window_bounds = array<i64: 128, 128>}, {pipeline_mode = #tpu.pipeline_mode<synchronous>, transform_indices = @transform_3, window_bounds = array<i64: 128, 128>}, {pipeline_mode = #tpu.pipeline_mode<synchronous>, transform_indices = @transform_4, window_bounds = array<i64: 128, 128>}, {pipeline_mode = #tpu.pipeline_mode<synchronous>, transform_indices = @transform_5, window_bounds = array<i64: 128, 256>}, {pipeline_mode = #tpu.pipeline_mode<synchronous>, transform_indices = @transform_6, window_bounds = array<i64: 128, 256>}, {pipeline_mode = #tpu.pipeline_mode<synchronous>, transform_indices = @transform_7, window_bounds = array<i64: 256, 128>}, {pipeline_mode = #tpu.pipeline_mode<synchronous>, transform_indices = @transform_8, window_bounds = array<i64: 128, 128>}, {pipeline_mode = #tpu.pipeline_mode<synchronous>, transform_indices = @transform_9, window_bounds = array<i64: 128, 128>}, {pipeline_mode = #tpu.pipeline_mode<synchronous>, transform_indices = @transform_10, window_bounds = array<i64: 1, 128>}, {pipeline_mode = #tpu.pipeline_mode<synchronous>, transform_indices = @transform_11, window_bounds = array<i64: 1, 128>}, {pipeline_mode = #tpu.pipeline_mode<synchronous>, transform_indices = @transform_12, window_bounds = array<i64: 1, 128>}, {pipeline_mode = #tpu.pipeline_mode<synchronous>, transform_indices = @transform_13, window_bounds = array<i64: 1, 128>}, {transform_indices = @transform_14, window_bounds = array<i64: 1, 64, 128>}]} {
    %c0 = arith.constant 0 : index
    %c0_0 = arith.constant 0 : index
    %c0_1 = arith.constant 0 : index
    %0 = vector.load %arg1[%c0, %c0_0, %c0_1] : memref<1x64x128xf32, #tpu.memory_space<vmem>>, vector<1x64x128xf32>
    %1 = vector.shape_cast %0 : vector<1x64x128xf32> to vector<64x128xf32>
    %2 = arith.truncf %1 : vector<64x128xf32> to vector<64x128xbf16>
    %c0_2 = arith.constant 0 : index
    %c0_3 = arith.constant 0 : index
    %3 = vector.load %arg9[%c0_2, %c0_3] : memref<128x128xbf16, #tpu.memory_space<vmem>>, vector<128x128xbf16>
    %c0_4 = arith.constant 0 : index
    %c0_5 = arith.constant 0 : index
    %4 = vector.load %arg10[%c0_4, %c0_5] : memref<128x128xbf16, #tpu.memory_space<vmem>>, vector<128x128xbf16>
    %c0_6 = arith.constant 0 : index
    %c0_7 = arith.constant 0 : index
    %5 = vector.load %arg2[%c0_6, %c0_7] : memref<128x128xbf16, #tpu.memory_space<vmem>>, vector<128x128xbf16>
    %cst = arith.constant dense<0.000000e+00> : vector<64x128xf32>
    %6 = tpu.matmul %2, %5, %cst {dimension_numbers = #tpu.dot_dimension_numbers<[1], [0], [0], [1], [0, 0, 1, 1], [], []>} : vector<64x128xbf16>, vector<128x128xbf16>, vector<64x128xf32> -> vector<64x128xf32>
    %c0_8 = arith.constant 0 : index
    %c0_9 = arith.constant 0 : index
    %7 = vector.load %arg3[%c0_8, %c0_9] : memref<128x128xbf16, #tpu.memory_space<vmem>>, vector<128x128xbf16>
    %cst_10 = arith.constant dense<0.000000e+00> : vector<64x128xf32>
    %8 = tpu.matmul %2, %7, %cst_10 {dimension_numbers = #tpu.dot_dimension_numbers<[1], [0], [0], [1], [0, 0, 1, 1], [], []>} : vector<64x128xbf16>, vector<128x128xbf16>, vector<64x128xf32> -> vector<64x128xf32>
    %c0_11 = arith.constant 0 : index
    %c0_12 = arith.constant 0 : index
    %9 = vector.load %arg4[%c0_11, %c0_12] : memref<128x128xbf16, #tpu.memory_space<vmem>>, vector<128x128xbf16>
    %cst_13 = arith.constant dense<0.000000e+00> : vector<64x128xf32>
    %10 = tpu.matmul %2, %9, %cst_13 {dimension_numbers = #tpu.dot_dimension_numbers<[1], [0], [0], [1], [0, 0, 1, 1], [], []>} : vector<64x128xbf16>, vector<128x128xbf16>, vector<64x128xf32> -> vector<64x128xf32>
    %cst_14 = arith.constant 1.562500e-02 : f32
    %11 = vector.broadcast %cst_14 : f32 to vector<64x128xf32>
    %12 = arith.mulf %10, %11 : vector<64x128xf32>
    %cst_15 = arith.constant 0.000000e+00 : f32
    %13 = vector.broadcast %cst_15 : f32 to vector<64x128xf32>
    %14 = arith.cmpf ogt, %6, %13 : vector<64x128xf32>
    %cst_16 = arith.constant 1.000000e+00 : f32
    %15 = vector.broadcast %cst_16 : f32 to vector<64x128xf32>
    %16 = arith.addf %6, %15 : vector<64x128xf32>
    %17 = math.exp %6 : vector<64x128xf32>
    %18 = arith.select %14, %16, %17 : vector<64x128xi1>, vector<64x128xf32>
    %cst_17 = arith.constant 0.000000e+00 : f32
    %19 = vector.broadcast %cst_17 : f32 to vector<64x128xf32>
    %20 = arith.cmpf ogt, %8, %19 : vector<64x128xf32>
    %cst_18 = arith.constant 1.000000e+00 : f32
    %21 = vector.broadcast %cst_18 : f32 to vector<64x128xf32>
    %22 = arith.addf %8, %21 : vector<64x128xf32>
    %23 = math.exp %8 : vector<64x128xf32>
    %24 = arith.select %20, %22, %23 : vector<64x128xi1>, vector<64x128xf32>
    %25 = arith.truncf %24 : vector<64x128xf32> to vector<64x128xbf16>
    %26 = arith.truncf %12 : vector<64x128xf32> to vector<64x128xbf16>
    %cst_19 = arith.constant dense<0.000000e+00> : vector<128x128xf32>
    %27 = tpu.matmul %25, %26, %cst_19 {dimension_numbers = #tpu.dot_dimension_numbers<[0], [0], [1], [1], [0, 1, 1, 1], [], []>} : vector<64x128xbf16>, vector<64x128xbf16>, vector<128x128xf32> -> vector<128x128xf32>
    %28 = arith.truncf %27 : vector<128x128xf32> to vector<128x128xbf16>
    %29 = arith.mulf %28, %3 : vector<128x128xbf16>
    %cst_20 = arith.constant dense<0.000000e+00> : vector<128xf32>
    %30 = vector.multi_reduction <add>, %24, %cst_20 [0] : vector<64x128xf32> to vector<128xf32>
    %31 = vector.shape_cast %30 : vector<128xf32> to vector<1x128xf32>
    %32 = vector.broadcast %31 : vector<1x128xf32> to vector<64x128xf32>
    %33 = arith.mulf %18, %32 : vector<64x128xf32>
    %34 = arith.truncf %33 : vector<64x128xf32> to vector<64x128xbf16>
    %cst_21 = arith.constant dense<0.000000e+00> : vector<64x128xf32>
    %35 = tpu.matmul %34, %3, %cst_21 {dimension_numbers = #tpu.dot_dimension_numbers<[1], [0], [0], [1], [0, 0, 1, 1], [], []>} : vector<64x128xbf16>, vector<128x128xbf16>, vector<64x128xf32> -> vector<64x128xf32>
    %cst_22 = arith.constant 9.99999997E-7 : f32
    %36 = vector.broadcast %cst_22 : f32 to vector<64x128xf32>
    %37 = arith.addf %35, %36 : vector<64x128xf32>
    %cst_23 = arith.constant 1.000000e+00 : f32
    %38 = vector.broadcast %cst_23 : f32 to vector<64x128xf32>
    %39 = arith.divf %38, %37 : vector<64x128xf32>
    %40 = arith.truncf %18 : vector<64x128xf32> to vector<64x128xbf16>
    %cst_24 = arith.constant dense<0.000000e+00> : vector<64x128xf32>
    %41 = tpu.matmul %40, %29, %cst_24 {dimension_numbers = #tpu.dot_dimension_numbers<[1], [0], [0], [1], [0, 0, 1, 1], [], []>} : vector<64x128xbf16>, vector<128x128xbf16>, vector<64x128xf32> -> vector<64x128xf32>
    %cst_25 = arith.constant 6.400000e+01 : f32
    %42 = vector.broadcast %cst_25 : f32 to vector<64x128xf32>
    %43 = arith.mulf %39, %42 : vector<64x128xf32>
    %44 = arith.mulf %41, %43 : vector<64x128xf32>
    %45 = arith.truncf %44 : vector<64x128xf32> to vector<64x128xbf16>
    %c0_26 = arith.constant 0 : index
    %c0_27 = arith.constant 0 : index
    %46 = vector.load %arg5[%c0_26, %c0_27] : memref<128x128xbf16, #tpu.memory_space<vmem>>, vector<128x128xbf16>
    %cst_28 = arith.constant dense<0.000000e+00> : vector<64x128xf32>
    %47 = tpu.matmul %45, %46, %cst_28 {dimension_numbers = #tpu.dot_dimension_numbers<[1], [0], [0], [1], [0, 0, 1, 1], [], []>} : vector<64x128xbf16>, vector<128x128xbf16>, vector<64x128xf32> -> vector<64x128xf32>
    %c0_29 = arith.constant 0 : index
    %c0_30 = arith.constant 0 : index
    %48 = vector.load %arg11[%c0_29, %c0_30] : memref<1x128xf32, #tpu.memory_space<vmem>>, vector<1x128xf32>
    %c0_31 = arith.constant 0 : index
    %c0_32 = arith.constant 0 : index
    %49 = vector.load %arg12[%c0_31, %c0_32] : memref<1x128xf32, #tpu.memory_space<vmem>>, vector<1x128xf32>
    %50 = arith.truncf %47 : vector<64x128xf32> to vector<64x128xbf16>
    %cst_33 = arith.constant dense<0.000000e+00> : vector<64x128xf32>
    %51 = tpu.matmul %50, %4, %cst_33 {dimension_numbers = #tpu.dot_dimension_numbers<[1], [0], [0], [1], [0, 0, 1, 1], [], []>} : vector<64x128xbf16>, vector<128x128xbf16>, vector<64x128xf32> -> vector<64x128xf32>
    %52 = arith.subf %47, %51 : vector<64x128xf32>
    %53 = arith.mulf %52, %52 : vector<64x128xf32>
    %54 = arith.truncf %53 : vector<64x128xf32> to vector<64x128xbf16>
    %cst_34 = arith.constant dense<0.000000e+00> : vector<64x128xf32>
    %55 = tpu.matmul %54, %4, %cst_34 {dimension_numbers = #tpu.dot_dimension_numbers<[1], [0], [0], [1], [0, 0, 1, 1], [], []>} : vector<64x128xbf16>, vector<128x128xbf16>, vector<64x128xf32> -> vector<64x128xf32>
    %cst_35 = arith.constant 9.99999974E-6 : f32
    %56 = vector.broadcast %cst_35 : f32 to vector<64x128xf32>
    %57 = arith.addf %55, %56 : vector<64x128xf32>
    %58 = math.rsqrt %57 : vector<64x128xf32>
    %59 = arith.mulf %52, %58 : vector<64x128xf32>
    %60 = vector.broadcast %48 : vector<1x128xf32> to vector<64x128xf32>
    %61 = arith.mulf %59, %60 : vector<64x128xf32>
    %62 = vector.broadcast %49 : vector<1x128xf32> to vector<64x128xf32>
    %63 = arith.addf %61, %62 : vector<64x128xf32>
    %c0_36 = arith.constant 0 : index
    %c0_37 = arith.constant 0 : index
    %64 = vector.load %arg6[%c0_36, %c0_37] : memref<128x256xbf16, #tpu.memory_space<vmem>>, vector<128x256xbf16>
    %cst_38 = arith.constant dense<0.000000e+00> : vector<64x256xf32>
    %65 = tpu.matmul %2, %64, %cst_38 {dimension_numbers = #tpu.dot_dimension_numbers<[1], [0], [0], [1], [0, 0, 1, 1], [], []>} : vector<64x128xbf16>, vector<128x256xbf16>, vector<64x256xf32> -> vector<64x256xf32>
    %66 = arith.truncf %63 : vector<64x128xf32> to vector<64x128xbf16>
    %c0_39 = arith.constant 0 : index
    %c0_40 = arith.constant 0 : index
    %67 = vector.load %arg7[%c0_39, %c0_40] : memref<128x256xbf16, #tpu.memory_space<vmem>>, vector<128x256xbf16>
    %cst_41 = arith.constant dense<0.000000e+00> : vector<64x256xf32>
    %68 = tpu.matmul %66, %67, %cst_41 {dimension_numbers = #tpu.dot_dimension_numbers<[1], [0], [0], [1], [0, 0, 1, 1], [], []>} : vector<64x128xbf16>, vector<128x256xbf16>, vector<64x256xf32> -> vector<64x256xf32>
    %69 = arith.addf %65, %68 : vector<64x256xf32>
    %cst_42 = arith.constant 0.000000e+00 : f32
    %70 = vector.broadcast %cst_42 : f32 to vector<64x256xf32>
    %71 = arith.maximumf %69, %70 : vector<64x256xf32>
    %72 = arith.truncf %71 : vector<64x256xf32> to vector<64x256xbf16>
    %c0_43 = arith.constant 0 : index
    %c0_44 = arith.constant 0 : index
    %73 = vector.load %arg8[%c0_43, %c0_44] : memref<256x128xbf16, #tpu.memory_space<vmem>>, vector<256x128xbf16>
    %cst_45 = arith.constant dense<0.000000e+00> : vector<64x128xf32>
    %74 = tpu.matmul %72, %73, %cst_45 {dimension_numbers = #tpu.dot_dimension_numbers<[1], [0], [0], [1], [0, 0, 1, 1], [], []>} : vector<64x256xbf16>, vector<256x128xbf16>, vector<64x128xf32> -> vector<64x128xf32>
    %c0_46 = arith.constant 0 : index
    %c0_47 = arith.constant 0 : index
    %75 = vector.load %arg13[%c0_46, %c0_47] : memref<1x128xf32, #tpu.memory_space<vmem>>, vector<1x128xf32>
    %c0_48 = arith.constant 0 : index
    %c0_49 = arith.constant 0 : index
    %76 = vector.load %arg14[%c0_48, %c0_49] : memref<1x128xf32, #tpu.memory_space<vmem>>, vector<1x128xf32>
    %77 = arith.truncf %74 : vector<64x128xf32> to vector<64x128xbf16>
    %cst_50 = arith.constant dense<0.000000e+00> : vector<64x128xf32>
    %78 = tpu.matmul %77, %4, %cst_50 {dimension_numbers = #tpu.dot_dimension_numbers<[1], [0], [0], [1], [0, 0, 1, 1], [], []>} : vector<64x128xbf16>, vector<128x128xbf16>, vector<64x128xf32> -> vector<64x128xf32>
    %79 = arith.subf %74, %78 : vector<64x128xf32>
    %80 = arith.mulf %79, %79 : vector<64x128xf32>
    %81 = arith.truncf %80 : vector<64x128xf32> to vector<64x128xbf16>
    %cst_51 = arith.constant dense<0.000000e+00> : vector<64x128xf32>
    %82 = tpu.matmul %81, %4, %cst_51 {dimension_numbers = #tpu.dot_dimension_numbers<[1], [0], [0], [1], [0, 0, 1, 1], [], []>} : vector<64x128xbf16>, vector<128x128xbf16>, vector<64x128xf32> -> vector<64x128xf32>
    %cst_52 = arith.constant 9.99999974E-6 : f32
    %83 = vector.broadcast %cst_52 : f32 to vector<64x128xf32>
    %84 = arith.addf %82, %83 : vector<64x128xf32>
    %85 = math.rsqrt %84 : vector<64x128xf32>
    %86 = arith.mulf %79, %85 : vector<64x128xf32>
    %87 = vector.broadcast %75 : vector<1x128xf32> to vector<64x128xf32>
    %88 = arith.mulf %86, %87 : vector<64x128xf32>
    %89 = vector.broadcast %76 : vector<1x128xf32> to vector<64x128xf32>
    %90 = arith.addf %88, %89 : vector<64x128xf32>
    %91 = arith.addf %1, %90 : vector<64x128xf32>
    %c0_53 = arith.constant 0 : index
    %c0_54 = arith.constant 0 : index
    %c0_55 = arith.constant 0 : index
    %92 = vector.load %arg15[%c0_53, %c0_54, %c0_55] : memref<1x64x128xf32, #tpu.memory_space<vmem>>, vector<1x64x128xf32>
    %93 = vector.shape_cast %92 : vector<1x64x128xf32> to vector<64x128xf32>
    %94 = vector.shape_cast %91 : vector<64x128xf32> to vector<1x64x128xf32>
    tpu.vector_store %arg15[%c0_53, %c0_54, %c0_55], %94 {strides = array<i32>} : memref<1x64x128xf32, #tpu.memory_space<vmem>>, vector<1x64x128xf32>,
    return
  }
  func.func @transform_0(%arg0: i32) -> (i32, i32, i32) {
    %c0_i32 = arith.constant 0 : i32
    %c0_i32_0 = arith.constant 0 : i32
    %c0_i32_1 = arith.constant 0 : i32
    return %arg0, %c0_i32, %c0_i32_0 : i32, i32, i32
  }
  func.func @transform_1(%arg0: i32) -> (i32, i32) {
    %c0_i32 = arith.constant 0 : i32
    %c0_i32_0 = arith.constant 0 : i32
    %c0_i32_1 = arith.constant 0 : i32
    return %c0_i32, %c0_i32_0 : i32, i32
  }
  func.func @transform_2(%arg0: i32) -> (i32, i32) {
    %c0_i32 = arith.constant 0 : i32
    %c0_i32_0 = arith.constant 0 : i32
    %c0_i32_1 = arith.constant 0 : i32
    return %c0_i32, %c0_i32_0 : i32, i32
  }
  func.func @transform_3(%arg0: i32) -> (i32, i32) {
    %c0_i32 = arith.constant 0 : i32
    %c0_i32_0 = arith.constant 0 : i32
    %c0_i32_1 = arith.constant 0 : i32
    return %c0_i32, %c0_i32_0 : i32, i32
  }
  func.func @transform_4(%arg0: i32) -> (i32, i32) {
    %c0_i32 = arith.constant 0 : i32
    %c0_i32_0 = arith.constant 0 : i32
    %c0_i32_1 = arith.constant 0 : i32
    return %c0_i32, %c0_i32_0 : i32, i32
  }
  func.func @transform_5(%arg0: i32) -> (i32, i32) {
    %c0_i32 = arith.constant 0 : i32
    %c0_i32_0 = arith.constant 0 : i32
    %c0_i32_1 = arith.constant 0 : i32
    return %c0_i32, %c0_i32_0 : i32, i32
  }
  func.func @transform_6(%arg0: i32) -> (i32, i32) {
    %c0_i32 = arith.constant 0 : i32
    %c0_i32_0 = arith.constant 0 : i32
    %c0_i32_1 = arith.constant 0 : i32
    return %c0_i32, %c0_i32_0 : i32, i32
  }
  func.func @transform_7(%arg0: i32) -> (i32, i32) {
    %c0_i32 = arith.constant 0 : i32
    %c0_i32_0 = arith.constant 0 : i32
    %c0_i32_1 = arith.constant 0 : i32
    return %c0_i32, %c0_i32_0 : i32, i32
  }
  func.func @transform_8(%arg0: i32) -> (i32, i32) {
    %c0_i32 = arith.constant 0 : i32
    %c0_i32_0 = arith.constant 0 : i32
    %c0_i32_1 = arith.constant 0 : i32
    return %c0_i32, %c0_i32_0 : i32, i32
  }
  func.func @transform_9(%arg0: i32) -> (i32, i32) {
    %c0_i32 = arith.constant 0 : i32
    %c0_i32_0 = arith.constant 0 : i32
    %c0_i32_1 = arith.constant 0 : i32
    return %c0_i32, %c0_i32_0 : i32, i32
  }
  func.func @transform_10(%arg0: i32) -> (i32, i32) {
    %c0_i32 = arith.constant 0 : i32
    %c0_i32_0 = arith.constant 0 : i32
    %c0_i32_1 = arith.constant 0 : i32
    return %c0_i32, %c0_i32_0 : i32, i32
  }
  func.func @transform_11(%arg0: i32) -> (i32, i32) {
    %c0_i32 = arith.constant 0 : i32
    %c0_i32_0 = arith.constant 0 : i32
    %c0_i32_1 = arith.constant 0 : i32
    return %c0_i32, %c0_i32_0 : i32, i32
  }
  func.func @transform_12(%arg0: i32) -> (i32, i32) {
    %c0_i32 = arith.constant 0 : i32
    %c0_i32_0 = arith.constant 0 : i32
    %c0_i32_1 = arith.constant 0 : i32
    return %c0_i32, %c0_i32_0 : i32, i32
  }
  func.func @transform_13(%arg0: i32) -> (i32, i32) {
    %c0_i32 = arith.constant 0 : i32
    %c0_i32_0 = arith.constant 0 : i32
    %c0_i32_1 = arith.constant 0 : i32
    return %c0_i32, %c0_i32_0 : i32, i32
  }
  func.func @transform_14(%arg0: i32) -> (i32, i32, i32) {
    %c0_i32 = arith.constant 0 : i32
    %c0_i32_0 = arith.constant 0 : i32
    %c0_i32_1 = arith.constant 0 : i32
    return %arg0, %c0_i32, %c0_i32_0 : i32, i32, i32
  }
}

</mosaic_0001>

<bundles_post_ra>
// kernel: tpu_custom_call.1
= control target key start
LH: loop header
LB: loop body
LE: loop exit
PB: predicated region body
PF: predicated region fallthrough
CT: control target
= control target key end

     0   :  { %s4937_s0 = inlined_call_operand.hbm [shape: f32[2,64,128], index: 0, kind: input, shape index: {}]   ;;  %s4938_s1 = inlined_call_operand.hbm [shape: bf16[128,128], index: 1, kind: input, shape index: {}]   ;;  %s4939_s2 = inlined_call_operand.hbm [shape: bf16[128,128], index: 2, kind: input, shape index: {}]   ;;  %s4940_s3 = inlined_call_operand.hbm [shape: bf16[128,128], index: 3, kind: input, shape index: {}]   ;;  %s4941_s4 = inlined_call_operand.hbm [shape: bf16[128,128], index: 4, kind: input, shape index: {}]   ;;  %s4942_s5 = inlined_call_operand.hbm [shape: bf16[128,256], index: 5, kind: input, shape index: {}]   ;;  %s4943_s6 = inlined_call_operand.hbm [shape: bf16[128,256], index: 6, kind: input, shape index: {}]   ;;  %s4944_s7 = inlined_call_operand.hbm [shape: bf16[256,128], index: 7, kind: input, shape index: {}]   ;;  %s4945_s8 = inlined_call_operand.hbm [shape: bf16[128,128], index: 8, kind: input, shape index: {}]   ;;  %s4946_s9 = inlined_call_operand.hbm [shape: bf16[128,128], index: 9, kind: input, shape index: {}]   ;;  %s4947_s10 = inlined_call_operand.vmem [shape: f32[1,128], index: 10, kind: input, shape index: {}]   ;;  %s4948_s11 = inlined_call_operand.vmem [shape: f32[1,128], index: 11, kind: input, shape index: {}]   ;;  %s4949_s12 = inlined_call_operand.vmem [shape: f32[1,128], index: 12, kind: input, shape index: {}]   ;;  %s4950_s13 = inlined_call_operand.vmem [shape: f32[1,128], index: 13, kind: input, shape index: {}]   ;;  %s4951_s14 = inlined_call_operand.hbm [shape: f32[2,64,128], index: 14, kind: output, shape index: {}]  }
   0x1   :  { %4965 = sst [smem:[#allocation27_spill]] %s4938_s1 }
   0x2   :  { %4966 = sst [smem:[#allocation28_spill]] %s4939_s2 }
   0x3   :  { %4967 = sst [smem:[#allocation29_spill]] %s4940_s3 }
   0x4   :  { %4968 = sst [smem:[#allocation30_spill]] %s4941_s4 }
   0x5   :  { %4969 = sst [smem:[#allocation31_spill]] %s4942_s5 }
   0x6   :  { %4970 = sst [smem:[#allocation32_spill]] %s4943_s6 }
   0x7   :  { %4971 = sst [smem:[#allocation33_spill]] %s4944_s7 }
   0x8   :  { %4972 = sst [smem:[#allocation34_spill]] %s4945_s8 }
   0x9   :  { %4973 = sst [smem:[#allocation35_spill]] %s4946_s9 }
   0xa   :  { %4974 = sst [smem:[#allocation36_spill]] %s4951_s14 }
   0xb   :  { %19 = vsyncpa [#allocation3], 0 }
   0xc   :  { %21 = vsyncpa [#allocation3 + $0x1], 0 }
   0xd   :  { %22 = vsyncpa [#allocation6], 0 }
   0xe   :  { %23 = vsyncpa [#allocation9], 0 }
   0xf   :  { %24 = vsyncpa [#allocation12], 0 }
  0x10   :  { %25 = vsyncpa [#allocation15], 0 }
  0x11   :  { %26 = vsyncpa [#allocation18], 0 }
  0x12   :  { %27 = vsyncpa [#allocation4], 0 }
  0x13   :  { %29 = vsyncpa [#allocation4 + $0x1], 0  ;;  %s4230_s29 = smov 0   ;;  %s4232_s30 = smov 0  }
  0x14   :  { %s4234_s15 = smov 0   ;;  %s4236_s16 = smov 0  }
  0x15 LB: > { %s4137_s17 = smov [#allocation5]   ;;  %s4251_s19 = sadd.s32 4294967295, %s4135_s16   ;;  %s4135_s16 = sphi %s4236_s16, %s5014_s16   ;;  %s4131_s15 = sphi %s4234_s15, %s5013_s15   ;;  %s4127_s30 = sphi %s4232_s30, %s5012_s30   ;;  %s4123_s29 = sphi %s4230_s29, %s5011_s29  }
  0x16   : > { %s377_s18 = sshll.u32 %s4137_s17, 4  ;;  %p2868_p0 = scmp.ge.s32.totalorder %s4135_s16, 1  ;;  %s378_s18 = int_to_ptr.vmem [resolvable:$true] %s377_s18 }
  0x17   : > { %p4961_p1 = scmp.eq.s32.totalorder %s4251_s19, 0  ;;  %p365_p2 = scmp.lt.s32.totalorder %s4135_s16, 3 }
  0x18   : > { %s4138_s21 = smov [#allocation8]   ;;  %s4139_s24 = smov [#allocation11]  }
  0x19   : > { %p4256_p3 = pnand %p2868_p0, %p365_p2  ;;  %s403_s22 = sshll.u32 %s4138_s21, 4  ;;  %s4269_s22 = int_to_ptr.vmem [resolvable:$true] %s403_s22 }
  0x1a   : > { %s429_s25 = sshll.u32 %s4139_s24, 4  ;;  %s3800_s27 = scalar_lea.vmem %s378_s18, 1024  ;;  %s4271_s25 = int_to_ptr.vmem [resolvable:$true] %s429_s25 }
  0x1b   : > { %s4975_s20 = scalar_select %p4256_p3, 1, 0 }
  0x1c   : > { %p3485_p5 = pneg %p4256_p3  ;;  %p3801_p8 = scmp.ne.s32.totalorder %s378_s18, %s3800_s27 }
  0x1d   : > { %p3808_p11 = scmp.lt.s32.totalorder %s378_s18, %s378_s18  ;;  %p3809_p12 = scmp.lt.s32.totalorder %s3800_s27, %s3800_s27 }
  0x1e   : > { %p4265_p6 = pnand %p3485_p5, %p4961_p1 }
  0x1f   : > { %p3810_p13 = por %p3809_p12, %p3808_p11 }
  0x20   : > { %p4275_p7 = pneg %p4265_p6 }
  0x22   : > { %p3803_p9 = pnand %p3801_p8, %p4275_p7 }
  0x24   : > { %p3804_p10 = pneg %p3803_p9 }
  0x26   : > { %p3811_p0 = pnand %p3810_p13, %p3804_p10 }
  0x28   : > { %3814 = shalt.err (!%p3811_p0)
}
  0x29   : > { %s4953_s28 = smov 64   ;;  %s4955_s17 = smov 4  }
  0x2a   : > { %s4978_s1 = sld [smem:[#allocation27_spill]]  ;;  %s3826_s14 = scalar_lea.vmem %s4269_s22, 1024 }
  0x2b   : > { %p3827_p2 = scmp.ne.s32.totalorder %s4269_s22, %s3826_s14  ;;  %p3834_p9 = scmp.lt.s32.totalorder %s4269_s22, %s4269_s22 }
  0x2c   : > { %p3835_p10 = scmp.lt.s32.totalorder %s3826_s14, %s3826_s14 }
  0x2d   : > { %p3829_p5 = pnand %p3827_p2, %p4275_p7 }
  0x2e   : > { %p3836_p11 = por %p3835_p10, %p3834_p9 }
  0x2f   : > { %p3830_p8 = pneg %p3829_p5 }
  0x30   : > { %3488 = dma.hbm_to_vmem [thread:$0]  (!%p4265_p6), %s4978_s1, 1024, %s378_s18, [#allocation6], %s4953_s28, %s4953_s28, %s4955_s17  }
  0x31   : > { %p3837_p12 = pnand %p3836_p11, %p3830_p8 }
  0x33   : > { %3840 = shalt.err (!%p3837_p12)
}
  0x34   : > { %s4979_s3 = sld [smem:[#allocation29_spill]]  ;;  %s3852_s18 = scalar_lea.vmem %s4271_s25, 2048 }
  0x35   : > { %p3853_p13 = scmp.ne.s32.totalorder %s4271_s25, %s3852_s18  ;;  %p3860_p5 = scmp.lt.s32.totalorder %s4271_s25, %s4271_s25 }
  0x36   : > { %p3861_p8 = scmp.lt.s32.totalorder %s3852_s18, %s3852_s18 }
  0x37   : > { %p3855_p0 = pnand %p3853_p13, %p4275_p7 }
  0x38   : > { %p3862_p9 = por %p3861_p8, %p3860_p5 }
  0x39   : > { %p3856_p2 = pneg %p3855_p0 }
  0x3a   : > { %3494 = dma.hbm_to_vmem [thread:$0]  (!%p4265_p6), %s4979_s3, 1024, %s4269_s22, [#allocation9], %s4953_s28, %s4953_s28, %s4955_s17  }
  0x3b   : > { %p3863_p10 = pnand %p3862_p9, %p3856_p2 }
  0x3d   : > { %3866 = shalt.err (!%p3863_p10)
}
  0x3e   : > { %s4957_s14 = smov 128   ;;  %s4959_s24 = smov 8  }
  0x3f   : > { %s4980_s5 = sld [smem:[#allocation31_spill]]  ;;  %s4144_s21 = smov [#allocation14]  }
  0x40   : > { %s455_s28 = sshll.u32 %s4144_s21, 4  ;;  %s4145_s18 = smov [#allocation7]   ;;  %s456_s28 = int_to_ptr.vmem [resolvable:$true] %s455_s28 }
  0x41   : > { %s390_s17 = sshll.u32 %s4145_s18, 4  ;;  %s3878_s1 = scalar_lea.vmem %s456_s28, 2048  ;;  %s391_s17 = int_to_ptr.vmem [resolvable:$true] %s390_s17 }
  0x42   : > { %p3879_p11 = scmp.ne.s32.totalorder %s456_s28, %s3878_s1  ;;  %p3886_p0 = scmp.lt.s32.totalorder %s456_s28, %s456_s28 }
  0x43   : > { %p3887_p2 = scmp.lt.s32.totalorder %s3878_s1, %s3878_s1 }
  0x44   : > { %p3881_p12 = pnand %p3879_p11, %p4275_p7 }
  0x45   : > { %3500 = dma.hbm_to_vmem [thread:$0]  (!%p4265_p6), %s4980_s5, 2048, %s4271_s25, [#allocation12], %s4957_s14, %s4957_s14, %s4959_s24  }
  0x46   : > { %p3882_p13 = pneg %p3881_p12  ;;  %p3888_p5 = por %p3887_p2, %p3886_p0 }
  0x48   : > { %p3889_p8 = pnand %p3888_p5, %p3882_p13 }
  0x4a   : > { %3892 = shalt.err (!%p3889_p8)
}
  0x4b   : > { %s4981_s3 = smov 4   ;;  %s4982_s22 = smov 64  }
  0x4c   : > { %s4983_s7 = sld [smem:[#allocation33_spill]]  ;;  %s3904_s21 = scalar_lea.vmem %s391_s17, 1024 }
  0x4d   : > { %p3905_p9 = scmp.ne.s32.totalorder %s391_s17, %s3904_s21  ;;  %p3912_p12 = scmp.lt.s32.totalorder %s391_s17, %s391_s17 }
  0x4e   : > { %p3913_p0 = scmp.lt.s32.totalorder %s3904_s21, %s3904_s21 }
  0x4f   : > { %p3907_p10 = pnand %p3905_p9, %p4275_p7 }
  0x50   : > { %p3914_p13 = por %p3913_p0, %p3912_p12 }
  0x51   : > { %p3908_p11 = pneg %p3907_p10 }
  0x52   : > { %3506 = dma.hbm_to_vmem [thread:$0]  (!%p4265_p6), %s4983_s7, 2048, %s456_s28, [#allocation15], %s4982_s22, %s4982_s22, %s4981_s3  }
  0x53   : > { %p3915_p2 = pnand %p3914_p13, %p3908_p11 }
  0x55   : > { %3918 = shalt.err (!%p3915_p2)
}
  0x56   : > { %s4984_s2 = sld [smem:[#allocation28_spill]]  ;;  %s4146_s28 = smov [#allocation10]  }
  0x57   : > { %s416_s25 = sshll.u32 %s4146_s28, 4  ;;  %s4147_s27 = smov [#allocation13]   ;;  %s417_s25 = int_to_ptr.vmem [resolvable:$true] %s416_s25 }
  0x58   : > { %s442_s14 = sshll.u32 %s4147_s27, 4  ;;  %s3930_s24 = scalar_lea.vmem %s417_s25, 1024  ;;  %s443_s14 = int_to_ptr.vmem [resolvable:$true] %s442_s14 }
  0x59   : > { %p3931_p5 = scmp.ne.s32.totalorder %s417_s25, %s3930_s24  ;;  %p3938_p10 = scmp.lt.s32.totalorder %s417_s25, %s417_s25 }
  0x5a   : > { %p3939_p11 = scmp.lt.s32.totalorder %s3930_s24, %s3930_s24 }
  0x5b   : > { %p3933_p8 = pnand %p3931_p5, %p4275_p7 }
  0x5c   : > { %3491 = dma.hbm_to_vmem [thread:$0]  (!%p4265_p6), %s4984_s2, 1024, %s391_s17, [#allocation6], %s4982_s22, %s4982_s22, %s4981_s3  }
  0x5d   : > { %p3934_p9 = pneg %p3933_p8  ;;  %p3940_p12 = por %p3939_p11, %p3938_p10 }
  0x5f   : > { %p3941_p0 = pnand %p3940_p12, %p3934_p9 }
  0x61   : > { %3944 = shalt.err (!%p3941_p0)
}
  0x62   : > { %s4985_s4 = sld [smem:[#allocation30_spill]]  ;;  %s3956_s1 = scalar_lea.vmem %s443_s14, 2048 }
  0x63   : > { %p3957_p13 = scmp.ne.s32.totalorder %s443_s14, %s3956_s1  ;;  %p3964_p8 = scmp.lt.s32.totalorder %s443_s14, %s443_s14 }
  0x64   : > { %p3965_p10 = scmp.lt.s32.totalorder %s3956_s1, %s3956_s1 }
  0x65   : > { %p3959_p2 = pnand %p3957_p13, %p4275_p7 }
  0x66   : > { %p3966_p9 = por %p3965_p10, %p3964_p8 }
  0x67   : > { %p3960_p5 = pneg %p3959_p2 }
  0x68   : > { %3497 = dma.hbm_to_vmem [thread:$0]  (!%p4265_p6), %s4985_s4, 1024, %s417_s25, [#allocation9], %s4982_s22, %s4982_s22, %s4981_s3  }
  0x69   : > { %p3967_p11 = pnand %p3966_p9, %p3960_p5 }
  0x6b   : > { %3970 = shalt.err (!%p3967_p11)
}
  0x6c   : > { %s4986_s24 = smov 8   ;;  %s4987_s18 = smov 128  }
  0x6d   : > { %s4988_s6 = sld [smem:[#allocation32_spill]]  ;;  %s4148_s25 = smov [#allocation16]  }
  0x6e   : > { %s468_s17 = sshll.u32 %s4148_s25, 4  ;;  %s4149_s21 = smov [#allocation17]   ;;  %s469_s17 = int_to_ptr.vmem [resolvable:$true] %s468_s17 }
  0x6f   : > { %s481_s2 = sshll.u32 %s4149_s21, 4  ;;  %s3982_s4 = scalar_lea.vmem %s469_s17, 1024  ;;  %s482_s2 = int_to_ptr.vmem [resolvable:$true] %s481_s2 }
  0x70   : > { %p3983_p12 = scmp.ne.s32.totalorder %s469_s17, %s3982_s4  ;;  %p3990_p2 = scmp.lt.s32.totalorder %s469_s17, %s469_s17 }
  0x71   : > { %p3991_p5 = scmp.lt.s32.totalorder %s3982_s4, %s3982_s4 }
  0x72   : > { %p3985_p0 = pnand %p3983_p12, %p4275_p7 }
  0x73   : > { %3503 = dma.hbm_to_vmem [thread:$0]  (!%p4265_p6), %s4988_s6, 2048, %s443_s14, [#allocation12], %s4987_s18, %s4987_s18, %s4986_s24  }
  0x74   : > { %p3986_p13 = pneg %p3985_p0  ;;  %p3992_p8 = por %p3991_p5, %p3990_p2 }
  0x76   : > { %p3993_p10 = pnand %p3992_p8, %p3986_p13 }
  0x78   : > { %3996 = shalt.err (!%p3993_p10)
}
  0x79   : > { %s4989_s8 = sld [smem:[#allocation34_spill]]  ;;  %s4008_s28 = scalar_lea.vmem %s482_s2, 1024 }
  0x7a   : > { %p4009_p9 = scmp.ne.s32.totalorder %s482_s2, %s4008_s28  ;;  %p4016_p0 = scmp.lt.s32.totalorder %s482_s2, %s482_s2 }
  0x7b   : > { %p4017_p2 = scmp.lt.s32.totalorder %s4008_s28, %s4008_s28 }
  0x7c   : > { %p4011_p11 = pnand %p4009_p9, %p4275_p7 }
  0x7d   : > { %p4018_p13 = por %p4017_p2, %p4016_p0 }
  0x7e   : > { %p4012_p12 = pneg %p4011_p11 }
  0x7f   : > { %3509 = dma.hbm_to_vmem [thread:$0]  (!%p4265_p6), %s4989_s8, 1024, %s469_s17, [#allocation15], %s4982_s22, %s4982_s22, %s4981_s3  }
  0x80   : > { %p4019_p5 = pnand %p4018_p13, %p4012_p12 }
  0x82   : > { %4022 = shalt.err (!%p4019_p5)
}
  0x83   : > { %s4990_s9 = sld [smem:[#allocation35_spill]]  ;;  %s2867_s23 = sadd.s32 4294967294, %s4135_s16  }
  0x84   : > { %s4381_s26 = sadd.s32 1, %s4135_s16   ;;  %s42_s25 = sadd.s32 1, %s4131_s15 }
  0x85   : > { %s39_s17 = ssub.s32 %s4135_s16, %s4381_s26  ;;  %p49_p7 = scmp.ne.s32.totalorder %s4131_s15, %s4127_s30 }
  0x86   : > { %p40_p8 = scmp.eq.s32.totalorder %s39_s17, 0  ;;  %p50_p10 = scmp.eq.s32.totalorder %s4135_s16, 0 }
  0x87   : > { %p55_p9 = scmp.ne.s32.totalorder %s4127_s30, %s4123_s29  ;;  %p352_p11 = scmp.eq.s32.totalorder %s4251_s19, 1 }
  0x88   : > { %s4393_s21 = scalar_select %p40_p8, %s4131_s15, %s42_s25  }
  0x89   : > { %3512 = dma.hbm_to_vmem [thread:$0]  (!%p4265_p6), %s4990_s9, 1024, %s482_s2, [#allocation18], %s4982_s22, %s4982_s22, %s4981_s3  }
  0x8a   : > { %p51_p12 = por %p50_p10, %p49_p7  ;;  %p4397_p0 = por %p4961_p1, %p55_p9 }
  0x8b   : > { %p4401_p6 = por %p352_p11, %p49_p7  ;;  %p358_p2 = scmp.eq.s32.totalorder %s2867_s23, 1 }
  0x8c   : > { %s4991_s14 = scalar_select %p4397_p0, 1, 0 }
  0x8d   : > { %s4992_s2 = scalar_select %p4401_p6, 1, 0 }
  0x8e   : > { %p3530_p13 = scmp.lt.s32.totalorder %s4135_s16, 2  ;;  %s507_s3 = sand.u32 1, %s4131_s15  }
  0x8f   : > { %p4407_p5 = por %p358_p2, %p55_p9  ;;  %s2879_s1 = sshll.u32 %s507_s3, 6 }
  0x90   : > { %s3007_s28 = sshll.u32 %s4135_s16, 10  ;;  %s511_s17 = scalar_lea.vmem [#allocation2], %s2879_s1 }
  0x91   : > { %s4993_s22 = scalar_select %p4407_p5, 1, 0 }
  0x92   : > { %s4415_s25 = scalar_lea.hbm %s4937_s0, %s3007_s28  ;;  %s518_s5 = sshll.u32 %s511_s17, 4  ;;  %s4421_s5 = int_to_ptr.vmem [resolvable:$true] %s518_s5 }
  0x93   : > { %p4417_p7 = pnand %p3530_p13, %p51_p12  ;;  %s4423_s6 = scalar_lea.sflag [#allocation3], %s507_s3 }
  0x94   : > { %s4023_s7 = scalar_lea.hbm %s4415_s25, 1024  ;;  %s4028_s1 = scalar_lea.hbm %s4937_s0, 2048 }
  0x95   : > { %p4024_p8 = scmp.ne.s32.totalorder %s4415_s25, %s4023_s7  ;;  %p4025_p10 = pneg %p4417_p7 }
  0x96   : > { %p4029_p12 = scmp.lt.s32.totalorder %s4415_s25, %s4937_s0  ;;  %p4030_p2 = scmp.lt.s32.totalorder %s4028_s1, %s4023_s7 }
  0x97   : > { %p4026_p9 = pnand %p4025_p10, %p4024_p8 }
  0x98   : > { %p4031_p13 = por %p4030_p2, %p4029_p12 }
  0x99   : > { %p4027_p11 = pneg %p4026_p9 }
  0x9b   : > { %p4032_p4 = pnand %p4031_p13, %p4027_p11 }
  0x9d   : > { %4035 = shalt.err (!%p4032_p4)
}
  0x9e   : > { %s4036_s3 = scalar_lea.vmem %s4421_s5, 1024  ;;  %s4150_s8 = smov [#allocation2]  }
  0x9f   : > { %p4037_p1 = scmp.ne.s32.totalorder %s4421_s5, %s4036_s3  ;;  %s4041_s9 = sshll.u32 %s4150_s8, 4  ;;  %s4042_s9 = int_to_ptr.vmem [resolvable:$false] %s4041_s9 }
  0xa0   : > { %s4043_s28 = scalar_lea.vmem %s4042_s9, 2048  ;;  %p4044_p9 = scmp.lt.s32.totalorder %s4421_s5, %s4042_s9 }
  0xa1   : > { %p4039_p5 = pnand %p4037_p1, %p4025_p10  ;;  %p4045_p6 = scmp.lt.s32.totalorder %s4043_s28, %s4036_s3 }
  0xa3   : > { %p4040_p8 = pneg %p4039_p5  ;;  %p4046_p0 = por %p4045_p6, %p4044_p9 }
  0xa5   : > { %p4047_p3 = pnand %p4046_p0, %p4040_p8 }
  0xa7   : > { %4050 = shalt.err (!%p4047_p3)
}
  0xa8   : > { %3516 = dma.hbm_to_vmem [thread:$0]  (!%p4417_p7), %s4415_s25, 1024, %s4421_s5, %s4423_s6, %s4987_s18, %s4987_s18, %s4986_s24  }
  0xa9   : > { %p4995_p1 = scmp.ne.s32.totalorder %s4975_s20, 0 }
  0xaa   : > { %s4450_s7 = sand.u32 (!%p4995_p1), 1, %s4127_s30   ;;  %p4996_p3 = scmp.ne.s32.totalorder (!%p4995_p1), %s4991_s14, 0 }
  0xab   : > { %530 = sbr.rel (%p4995_p1) target bundleno = 2516 (0x9d4), region = 76  ;;  %s2883_s8 = sshll.u32 (!%p4995_p1), %s4450_s7, 6 }
  0xac   : > { %s533_s9 = scalar_lea.sflag (!%p4995_p1), [#allocation3], %s4450_s7  ;;  %s4456_s23 = scalar_lea.vmem (!%p4995_p1), [#allocation2], %s2883_s8 }
  0xb0   : > { %4094 = dma.done.wait (%p4996_p3), %s533_s9, 1024  }
  0xb1   : > { %4096 = vsyncadd (%p4996_p3), %s533_s9, 4294966272  ;;  %p4997_p4 = scmp.eq.s32.totalorder %s4251_s19, 0 }
  0xb3   : > { %4098 = dma.done.wait (%p4997_p4), [#allocation6], 2048   ;;  %p4998_p0 = pmov %p4997_p4 }
  0xb5   : > { %4100 = vsyncadd (%p4998_p0), [#allocation6], 4294965248  ;;  %p4999_p6 = pmov %p4998_p0 }
  0xb6   : > { %p5000_p5 = pmov %p4998_p0 }
  0xb7   : > { %4102 = dma.done.wait (%p4999_p6), [#allocation9], 2048  }
  0xb8   : > { %4104 = vsyncadd (%p5000_p5), [#allocation9], 4294965248  ;;  %p5001_p7 = pmov %p4998_p0 }
  0xb9   : > { %p5002_p10 = pmov %p4998_p0 }
  0xba   : > { %4106 = dma.done.wait (%p5001_p7), [#allocation12], 4096  }
  0xbb   : > { %4108 = vsyncadd (%p5002_p10), [#allocation12], 4294963200  ;;  %p5003_p11 = pmov %p4998_p0 }
  0xbc   : > { %p5004_p12 = pmov %p4998_p0 }
  0xbd   : > { %4110 = dma.done.wait (%p5003_p11), [#allocation15], 3072  }
  0xbe   : > { %4112 = vsyncadd (%p5004_p12), [#allocation15], 4294964224  ;;  %p5005_p2 = pmov %p4998_p0 }
  0xbf   : > { %p5006_p13 = pmov %p4998_p0 }
  0xc0   : > { %4114 = dma.done.wait (%p5005_p2), [#allocation18], 1024  }
  0xc1   : > { %4116 = vsyncadd (%p5006_p13), [#allocation18], 4294966272  ;;  %v3589_v0 = vld [vmem:[#allocation7 + $0x38] sm:$0xff]   ;;  %v3590_v1 = vld [vmem:[#allocation7 + $0x30] sm:$0xff]   ;;  %s4866_s1 = scalar_lea.vmem [#allocation19], %s2883_s8  ;;  %s3008_s27 = sshll.u32 %s4251_s19, 10 }
  0xc2   : > { %3205 = vmatprep.subr.bf16.mxu1 %v3589_v0  ;;  %v3591_v2 = vld [vmem:[#allocation7 + $0x28] sm:$0xff]   ;;  %v3594_v3 = vld [vmem:[#allocation5 + $0x38] sm:$0xff]   ;;  %v3596_v4 = vld [vmem:[#allocation5 + $0x30] sm:$0xff]   ;;  %s2708_s17 = sshll.u32 %s4866_s1, 4  ;;  %s5007_s8 = sld [smem:[#allocation36_spill]]  ;;  %s4891_s17 = int_to_ptr.vmem [resolvable:$true] %s2708_s17 }
  0xc3   : > { %3206 = vmatpush3.bf16.msra.mxu1 %v3589_v0  ;;  %3181 = vmatprep.subr.bf16.mxu0 %v3594_v3  ;;  %v3592_v5 = vld [vmem:[#allocation7 + $0x20] sm:$0xff]   ;;  %v3598_v6 = vld [vmem:[#allocation5 + $0x28] sm:$0xff]   ;;  %v3593_v7 = vld [vmem:[#allocation7 + $0x18] sm:$0xff]   ;;  %s2695_s19 = scalar_lea.sflag [#allocation4], %s4450_s7  ;;  %s4051_s5 = scalar_lea.vmem %s4891_s17, 1024 }
  0xc4   : > { %3207 = vmatprep.subr.bf16.mxu1 %v3590_v1  ;;  %3182 = vmatpush3.bf16.msra.mxu0 %v3594_v3  ;;  %v618_v8 = vld [vmem:[%s4456_s23] sm:$0xff]  ;;  %v619_v9 = vld [vmem:[%s4456_s23 + $0x8] sm:$0xff]  ;;  %v3595_v12 = vld [vmem:[#allocation7 + $0x10] sm:$0xff]   ;;  %p4052_p8 = scmp.ne.s32.totalorder %s4891_s17, %s4051_s5  ;;  %p5008_p9 = scmp.ne.s32.totalorder %s4992_s2, 0 }
  0xc5   : > { %3183 = vmatprep.subr.bf16.mxu0 %v3596_v4  ;;  %v3600_v10 = vld [vmem:[#allocation5 + $0x20] sm:$0xff]   ;;  %v4484_v11 = vpack.c.bf16 %v619_v9, %v618_v8  ;;  %v3601_v13 = vld [vmem:[#allocation5 + $0x18] sm:$0xff]   ;;  %v3597_v14 = vld [vmem:[#allocation7 + $0x8] sm:$0xff]   ;;  %s4152_s6 = smov [#allocation19]  }
  0xc6   : > { %v3602_v15 = vld [vmem:[#allocation5 + $0x10] sm:$0xff]   ;;  %v3599_v16 = vld [vmem:[#allocation7] sm:$0xff]   ;;  %v621_v18 = vld [vmem:[%s4456_s23 + $0x18] sm:$0xff]  ;;  %p4053_p1 = pnand %p4052_p8, %p5008_p9  ;;  %s4055_s20 = sshll.u32 %s4152_s6, 4  ;;  %s4056_s20 = int_to_ptr.vmem [resolvable:$false] %s4055_s20 }
  0xc7   : > { %3208 = vmatpush3.bf16.msra.mxu1 %v3590_v1  ;;  %3221 = vmatprep.mubr.bf16.mxu1 %v4484_v11  ;;  %v620_v17 = vld [vmem:[%s4456_s23 + $0x10] sm:$0xff]  ;;  %v3603_v19 = vld [vmem:[#allocation5 + $0x8] sm:$0xff]   ;;  %v622_v20 = vld [vmem:[%s4456_s23 + $0x20] sm:$0xff]  ;;  %s4057_s24 = scalar_lea.vmem %s4056_s20, 2048  ;;  %p4058_p4 = scmp.lt.s32.totalorder %s4891_s17, %s4056_s20 }
  0xc8   : > { %3209 = vmatprep.subr.bf16.mxu1 %v3591_v2  ;;  %3184 = vmatpush3.bf16.msra.mxu0 %v3596_v4  ;;  %v623_v21 = vld [vmem:[%s4456_s23 + $0x28] sm:$0xff]  ;;  %v3604_v22 = vld [vmem:[#allocation5] sm:$0xff]   ;;  %v4492_v23 = vpack.c.bf16 %v621_v18, %v620_v17  ;;  %v3605_v25 = vld [vmem:[#allocation8 + $0x38] sm:$0xff]   ;;  %s4889_s9 = scalar_lea.hbm %s5007_s8, %s3008_s27  ;;  %p4054_p3 = pneg %p4053_p1 }
  0xc9   : > { %3185 = vmatprep.subr.bf16.mxu0 %v3598_v6  ;;  %3197 = vmatprep.mubr.bf16.mxu0 %v4484_v11  ;;  %v4494_v24 = vpack.c.bf16 %v623_v21, %v622_v20  ;;  %v624_v26 = vld [vmem:[%s4456_s23 + $0x30] sm:$0xff]  ;;  %v625_v27 = vld [vmem:[%s4456_s23 + $0x38] sm:$0xff]  ;;  %v3607_v30 = vld [vmem:[#allocation8 + $0x28] sm:$0xff]   ;;  %p4059_p0 = scmp.lt.s32.totalorder %s4057_s24, %s4051_s5 }
  0xca   : > { %v3606_v28 = vld [vmem:[#allocation8 + $0x30] sm:$0xff]   ;;  %v4500_v29 = vpack.c.bf16 %v625_v27, %v624_v26  ;;  %v3608_v31 = vld [vmem:[#allocation8 + $0x20] sm:$0xff]   ;;  %v3609_v32 = vld [vmem:[#allocation8 + $0x18] sm:$0xff]  }
  0xcb   : > { %3210 = vmatpush3.bf16.msra.mxu1 %v3591_v2  ;;  %v3610_v33 = vld [vmem:[#allocation8 + $0x10] sm:$0xff]   ;;  %v3611_v34 = vld [vmem:[#allocation8 + $0x8] sm:$0xff]   ;;  %v3612_v35 = vld [vmem:[#allocation8] sm:$0xff]   ;;  %p4060_p6 = por %p4059_p0, %p4058_p4 }
  0xcc   : > { %3211 = vmatprep.subr.bf16.mxu1 %v3592_v5  ;;  %3186 = vmatpush3.bf16.msra.mxu0 %v3598_v6 }
  0xcd   : > { %3187 = vmatprep.subr.bf16.mxu0 %v3600_v10  ;;  %p4061_p5 = pnand %p4060_p6, %p4054_p3 }
  0xcf   : > { %3212 = vmatpush3.bf16.msra.mxu1 %v3592_v5 }
  0xd0   : > { %3213 = vmatprep.subr.bf16.mxu1 %v3593_v7  ;;  %3188 = vmatpush3.bf16.msra.mxu0 %v3600_v10 }
  0xd1   : > { %3189 = vmatprep.subr.bf16.mxu0 %v3601_v13 }
  0xd3   : > { %3214 = vmatpush3.bf16.msra.mxu1 %v3593_v7 }
  0xd4   : > { %3215 = vmatprep.subr.bf16.mxu1 %v3595_v12  ;;  %3190 = vmatpush3.bf16.msra.mxu0 %v3601_v13 }
  0xd5   : > { %3191 = vmatprep.subr.bf16.mxu0 %v3602_v15 }
  0xd7   : > { %3216 = vmatpush3.bf16.msra.mxu1 %v3595_v12 }
  0xd8   : > { %3217 = vmatprep.subr.bf16.mxu1 %v3597_v14  ;;  %3192 = vmatpush3.bf16.msra.mxu0 %v3602_v15 }
  0xd9   : > { %3193 = vmatprep.subr.bf16.mxu0 %v3603_v19 }
  0xdb   : > { %3218 = vmatpush3.bf16.msra.mxu1 %v3597_v14 }
  0xdc   : > { %3219 = vmatprep.subr.bf16.mxu1 %v3599_v16  ;;  %3194 = vmatpush3.bf16.msra.mxu0 %v3603_v19 }
  0xdd   : > { %3195 = vmatprep.subr.bf16.mxu0 %v3604_v22 }
  0xdf   : > { %3220 = vmatpush3.bf16.msra.mxu1 %v3599_v16 }
  0xe0   : > { %3196 = vmatpush3.bf16.msra.mxu0 %v3604_v22 }
  0xe1   : > { %3229 = vmatprep.subr.bf16.mxu0 %v3605_v25 }
  0xe2   : > { %3222 = vmatmul.mubr.bf16.vlgmr.msra.gmra.mxu1 %v4492_v23 }
  0xe3   : > { %3225 = vmatprep.mubr.bf16.mxu1 %v4494_v24  ;;  %3198 = vmatmul.mubr.bf16.vlgmr.msra.gmra.mxu0 %v4492_v23 }
  0xe4   : > { %3201 = vmatprep.mubr.bf16.mxu0 %v4494_v24  ;;  %3230 = vmatpush3.bf16.msra.mxu0 %v3605_v25 }
  0xe5   : > { %3231 = vmatprep.subr.bf16.mxu0 %v3606_v28 }
  0xe8   : > { %3232 = vmatpush3.bf16.msra.mxu0 %v3606_v28 }
  0xe9   : > { %3233 = vmatprep.subr.bf16.mxu0 %v3607_v30 }
  0xea   : > { %3226 = vmatmul.mubr.bf16.gmra.mxu1 %v4500_v29 }
  0xeb   : > { %3202 = vmatmul.mubr.bf16.gmra.mxu0 %v4500_v29 }
  0xec   : > { %3234 = vmatpush3.bf16.msra.mxu0 %v3607_v30  ;;  %3245 = vmatprep.mubr.bf16.mxu0 %v4484_v11 }
  0xed   : > { %3235 = vmatprep.subr.bf16.mxu0 %v3608_v31 }
  0xf0   : > { %3236 = vmatpush3.bf16.msra.mxu0 %v3608_v31 }
  0xf1   : > { %3237 = vmatprep.subr.bf16.mxu0 %v3609_v32 }
  0xf4   : > { %3238 = vmatpush3.bf16.msra.mxu0 %v3609_v32 }
  0xf5   : > { %3239 = vmatprep.subr.bf16.mxu0 %v3610_v33 }
  0xf8   : > { %3240 = vmatpush3.bf16.msra.mxu0 %v3610_v33 }
  0xf9   : > { %3241 = vmatprep.subr.bf16.mxu0 %v3611_v34 }
  0xfc   : > { %3242 = vmatpush3.bf16.msra.mxu0 %v3611_v34 }
  0xfd   : > { %3243 = vmatprep.subr.bf16.mxu0 %v3612_v35 }
 0x100   : > { %3244 = vmatpush3.bf16.msra.mxu0 %v3612_v35 }
 0x103   : > { %3246 = vmatmul.mubr.bf16.vlgmr.msra.gmra.mxu0 %v4492_v23 }
 0x104   : > { %3249 = vmatprep.mubr.bf16.mxu0 %v4494_v24 }
 0x10b   : > { %3250 = vmatmul.mubr.bf16.gmra.mxu0 %v4500_v29 }
 0x1a2   : > { %v4510_v36 = vpop.f32.mrf.mxu1 }
 0x1a3   : > { %v1117_v37 = vmul.f32 1.442695, %v4510_v36  ;;  %v4519_v42 = vpop.f32.mrf.mxu0  ;;  %vm1099_vm0 = vcmp.gt.f32.partialorder %v4510_v36, 0.0  ;;  %v1107_v5 = vadd.f32 1.0, %v4510_v36 }
 0x1a4   : > { %v4513_v38 = vpop.f32.mrf.mxu1  ;;  %v1077_v44 = vmul.f32 1.442695, %v4519_v42  ;;  %v1067_v13 = vadd.f32 1.0, %v4519_v42  ;;  %vm1059_vm4 = vcmp.gt.f32.partialorder %v4519_v42, 0.0 }
 0x1a5   : > { %v1113_v39 = vmul.f32 1.442695, %v4513_v38  ;;  %3701 = vpow2.f32 %v1117_v37  ;;  %v4522_v46 = vpop.f32.mrf.mxu0  ;;  %v1105_v6 = vadd.f32 1.0, %v4513_v38  ;;  %vm1097_vm2 = vcmp.gt.f32.partialorder %v4513_v38, 0.0 }
 0x1a6   : > { %v4516_v40 = vpop.f32.mrf.mxu1  ;;  %v1073_v48 = vmul.f32 1.442695, %v4522_v46  ;;  %v1065_v19 = vadd.f32 1.0, %v4522_v46  ;;  %vm1057_vm6 = vcmp.gt.f32.partialorder %v4522_v46, 0.0 }
 0x1a7   : > { %v1119_v41 = vmul.f32 1.442695, %v4516_v40  ;;  %3703 = vpow2.f32 %v1113_v39  ;;  %v4527_v49 = vpop.f32.mrf.mxu0  ;;  %vm1100_vm1 = vcmp.gt.f32.partialorder %v4516_v40, 0.0  ;;  %v1108_v9 = vadd.f32 1.0, %v4516_v40 }
 0x1a8   : > { %v892_v43 = vpop.f32.mrf.mxu1  ;;  %v1079_v51 = vmul.f32 1.442695, %v4527_v49  ;;  %v1068_v14 = vadd.f32 1.0, %v4527_v49  ;;  %vm1060_vm5 = vcmp.gt.f32.partialorder %v4527_v49, 0.0 }
 0x1a9   : > { %v1115_v45 = vmul.f32 1.442695, %v892_v43  ;;  %3705 = vpow2.f32 %v1119_v41  ;;  %v4534_v54 = vpop.f32.mrf.mxu0  ;;  %v1106_v10 = vadd.f32 1.0, %v892_v43  ;;  %vm1098_vm3 = vcmp.gt.f32.partialorder %v892_v43, 0.0 }
 0x1aa   : > { %v4524_v47 = vpop.f32.mrf.mxu1  ;;  %v1075_v56 = vmul.f32 1.442695, %v4534_v54  ;;  %v1066_v20 = vadd.f32 1.0, %v4534_v54  ;;  %vm1058_vm7 = vcmp.gt.f32.partialorder %v4534_v54, 0.0 }
 0x1ab   : > { %3707 = vpow2.f32 %v1115_v45  ;;  %v1125_v52 = vmul.f32 1.442695, %v4524_v47  ;;  %v4540_v58 = vpop.f32.mrf.mxu0  ;;  %vm1103_vm8 = vcmp.gt.f32.partialorder %v4524_v47, 0.0  ;;  %v1111_v34 = vadd.f32 1.0, %v4524_v47 }
 0x1ac   : > { %v4529_v50 = vpop.f32.mrf.mxu1  ;;  %3709 = vpow2.f32 %v1077_v44  ;;  %v1085_v60 = vmul.f32 1.442695, %v4540_v58  ;;  %v1071_v49 = vadd.f32 1.0, %v4540_v58  ;;  %vm1063_vm12 = vcmp.gt.f32.partialorder %v4540_v58, 0.0 }
 0x1ad   : > { %v1121_v53 = vmul.f32 1.442695, %v4529_v50  ;;  %3711 = vpow2.f32 %v1073_v48  ;;  %v4546_v62 = vpop.f32.mrf.mxu0  ;;  %vm1101_vm9 = vcmp.gt.f32.partialorder %v4529_v50, 0.0  ;;  %v1109_v35 = vadd.f32 1.0, %v4529_v50 }
 0x1ae   : > { %v4536_v55 = vpop.f32.mrf.mxu1  ;;  %3713 = vpow2.f32 %v1079_v51  ;;  %v1081_v63 = vmul.f32 1.442695, %v4546_v62  ;;  %vm1061_vm14 = vcmp.gt.f32.partialorder %v4546_v62, 0.0 }
 0x1af   : > { %3715 = vpow2.f32 %v1121_v53  ;;  %v1127_v57 = vmul.f32 1.442695, %v4536_v55  ;;  %v4549_v0 = vpop.f32.mrf.mxu0  ;;  %vm1104_vm10 = vcmp.gt.f32.partialorder %v4536_v55, 0.0 }
 0x1b0   : > { %v4542_v59 = vpop.f32.mrf.mxu1  ;;  %3717 = vpow2.f32 %v1075_v56  ;;  %v1087_v1 = vmul.f32 1.442695, %v4549_v0  ;;  %v1072_v50 = vadd.f32 1.0, %v4549_v0  ;;  %vm1064_vm13 = vcmp.gt.f32.partialorder %v4549_v0, 0.0 }
 0x1b1   : > { %3719 = vpow2.f32 %v1125_v52  ;;  %v1123_v61 = vmul.f32 1.442695, %v4542_v59  ;;  %v4553_v3 = vpop.f32.mrf.mxu0  ;;  %v1110_v43 = vadd.f32 1.0, %v4542_v59  ;;  %vm1102_vm11 = vcmp.gt.f32.partialorder %v4542_v59, 0.0 }
 0x1b2   : > { %3721 = vpow2.f32 %v1127_v57  ;;  %v3702_v2 = vpop.eup %3701  ;;  %v1083_v7 = vmul.f32 1.442695, %v4553_v3  ;;  %v1112_v52 = vadd.f32 1.0, %v4536_v55  ;;  %v1069_v56 = vadd.f32 1.0, %v4546_v62 }
 0x1b3   : > { %3723 = vpow2.f32 %v1123_v61  ;;  %v1131_v26 = vsel %vm1099_vm0, %v1107_v5, %v3702_v2  ;;  %v1070_v57 = vadd.f32 1.0, %v4553_v3  ;;  %vm1062_vm15 = vcmp.gt.f32.partialorder %v4553_v3, 0.0 }
 0x1b4   : > { %3725 = vpow2.f32 %v1085_v60  ;;  %v3704_v4 = vpop.eup %3703  ;;  %vm1161_vm0 = vcmask 523264  }
 0x1b5   : > { %3727 = vpow2.f32 %v1081_v63  ;;  %v1129_v16 = vsel %vm1097_vm2, %v1105_v6, %v3704_v4 }
 0x1b6   : > { %3729 = vpow2.f32 %v1087_v1  ;;  %v3706_v8 = vpop.eup %3705 }
 0x1b7   : > { %3731 = vpow2.f32 %v1083_v7  ;;  %v1132_v27 = vsel %vm1100_vm1, %v1108_v9, %v3706_v8 }
 0x1b8   : > { %v3708_v12 = vpop.eup %3707  ;;  %v1138_v38 = vpack.c.bf16 %v1132_v27, %v1131_v26 }
 0x1b9   : > { %v3710_v15 = vpop.eup %3709  ;;  %v1130_v17 = vsel %vm1098_vm3, %v1106_v10, %v3708_v12 }
 0x1ba   : > { %v3712_v18 = vpop.eup %3711  ;;  %v1137_v21 = vpack.c.bf16 %v1130_v17, %v1129_v16  ;;  %v1347_v22 = vadd.f32 %v1130_v17, %v1129_v16  ;;  %v4576_v30 = vsel %vm1059_vm4, %v1067_v13, %v3710_v15 }
 0x1bb   : > { %v3714_v25 = vpop.eup %3713  ;;  %v1089_v40 = vsel %vm1057_vm6, %v1065_v19, %v3712_v18 }
 0x1bc   : > { %v3716_v28 = vpop.eup %3715  ;;  %v4580_v31 = vsel %vm1060_vm5, %v1068_v14, %v3714_v25  ;;  %1145 = vxpose.xlu0.c.b16.start [1/4] (short) %v1137_v21, 128  ;;  %v1348_v32 = vadd.f32 %v1347_v22, %v1131_v26 }
 0x1bd   : > { %v3718_v33 = vpop.eup %3717  ;;  %v1454_v36 = vpack.c.bf16 %v4580_v31, %v4576_v30  ;;  %v1133_v44 = vsel %vm1101_vm9, %v1109_v35, %v3716_v28 }
 0x1be   : > { %v3720_v37 = vpop.eup %3719  ;;  %v1349_v39 = vadd.f32 %v1348_v32, %v1132_v27  ;;  %v1090_v41 = vsel %vm1058_vm7, %v1066_v20, %v3718_v33 }
 0x1bf   : > { %v3722_v42 = vpop.eup %3721  ;;  %v1453_v45 = vpack.c.bf16 %v1090_v41, %v1089_v40  ;;  %v1135_v63 = vsel %vm1103_vm8, %v1111_v34, %v3720_v37 }
 0x1c0   : > { %v3724_v48 = vpop.eup %3723  ;;  %1146 = vxpose.xlu0.c.b16.cont [2/4] (short) %v1138_v38, 128  ;;  %v1350_v46 = vadd.f32 %v1349_v39, %v1133_v44  ;;  %v1136_v58 = vsel %vm1104_vm10, %v1112_v52, %v3722_v42 }
 0x1c1   : > { %v3726_v51 = vpop.eup %3725  ;;  %v1134_v53 = vsel %vm1102_vm11, %v1110_v43, %v3724_v48  ;;  %3317 = vmatprep.mubr.bf16.mxu0 %v1453_v45  ;;  %v1140_v3 = vpack.c.bf16 %v1136_v58, %v1135_v63 }
 0x1c2   : > { %v3728_v54 = vpop.eup %3727  ;;  %v1139_v59 = vpack.c.bf16 %v1134_v53, %v1133_v44  ;;  %v1351_v60 = vadd.f32 %v1350_v46, %v1134_v53  ;;  %v4607_v0 = vsel %vm1063_vm12, %v1071_v49, %v3726_v51  ;;  %v4646_v53 = vld [vmem:[#allocation16 + $0x38] sm:$0xff]  }
 0x1c3   : > { %v3730_v61 = vpop.eup %3729  ;;  %v4613_v6 = vsel %vm1061_vm14, %v1069_v56, %v3728_v54  ;;  %v3247_v7 = vpop.f32.mrf.mxu0  ;;  %v4650_v56 = vld [vmem:[#allocation16 + $0x30] sm:$0xff]  }
 0x1c4   : > { %v4609_v1 = vsel %vm1064_vm13, %v1072_v50, %v3730_v61  ;;  %1147 = vxpose.xlu0.c.b16.cont [3/4] (short) %v1139_v59, 128  ;;  %v1352_v2 = vadd.f32 %v1351_v60, %v1135_v63  ;;  %v3732_v4 = vpop.eup %3731  ;;  %v1051_v21 = vmul.f32 0.015625, %v3247_v7  ;;  %v4655_v59 = vld [vmem:[#allocation16 + $0x28] sm:$0xff]   ;;  %v4660_v61 = vld [vmem:[#allocation16 + $0x20] sm:$0xff]  }
 0x1c5   : > { %v1456_v5 = vpack.c.bf16 %v4609_v1, %v4607_v0  ;;  %v4615_v62 = vsel %vm1062_vm15, %v1070_v57, %v3732_v4  ;;  %v1018_v9 = vpop.f32.mrf.mxu0  ;;  %v4670_v4 = vld [vmem:[#allocation16 + $0x10] sm:$0xff]  }
 0x1c6   : > { %v1353_v47 = vadd.f32 %v1352_v2, %v1136_v58  ;;  %v1455_v55 = vpack.c.bf16 %v4615_v62, %v4613_v6  ;;  %v1049_v50 = vmul.f32 0.015625, %v1018_v9  ;;  %v4665_v58 = vld [vmem:[#allocation16 + $0x18] sm:$0xff]  }
 0x1c7   : > { %v3248_v12 = vpop.f32.mrf.mxu0 }
 0x1c8   : > { %v1354_v8 = vrot.slane %v1353_v47, 4  ;;  %1148 = vxpose.xlu0.c.b16.end [4/4] (short) %v1140_v3, 128  ;;  %v1052_v22 = vmul.f32 0.015625, %v3248_v12  ;;  %v3622_v12 = vld [vmem:[#allocation10 + $0x30] sm:$0xff]  }
 0x1c9   : > { %v1021_v14 = vpop.f32.mrf.mxu0 }
 0x1ca   : > { %v1355_v10 = vadd.f32 %v1354_v8, %v1353_v47  ;;  %v1142_v46 = vpack.c.bf16 %v1052_v22, %v1051_v21  ;;  %v1050_v51 = vmul.f32 0.015625, %v1021_v14  ;;  %v4675_v47 = vld [vmem:[#allocation16 + $0x8] sm:$0xff]   ;;  %v4680_v8 = vld [vmem:[#allocation16] sm:$0xff]  }
 0x1cb   : > { %v3251_v16 = vpop.f32.mrf.mxu0  ;;  %v3624_v14 = vld [vmem:[#allocation10 + $0x20] sm:$0xff]  }
 0x1cc   : > { %v1356_v13 = vrot.slane %v1355_v10, 2  ;;  %v1055_v20 = vmul.f32 0.015625, %v3251_v16  ;;  %v1141_v52 = vpack.c.bf16 %v1050_v51, %v1049_v50 }
 0x1cd   : > { %v1034_v18 = vpop.f32.mrf.mxu0 }
 0x1ce   : > { %v1357_v15 = vadd.f32 %v1356_v13, %v1355_v10  ;;  %v1053_v25 = vmul.f32 0.015625, %v1034_v18  ;;  %v3621_v10 = vld [vmem:[#allocation10 + $0x38] sm:$0xff]   ;;  %v3623_v13 = vld [vmem:[#allocation10 + $0x28] sm:$0xff]  }
 0x1cf   : > { %v3252_v26 = vpop.f32.mrf.mxu0 }
 0x1d0   : > { %v1358_v17 = vrot.slane %v1357_v15, 1  ;;  %v1056_v27 = vmul.f32 0.015625, %v3252_v26 }
 0x1d1   : > { %v1037_v34 = vpop.f32.mrf.mxu0 }
 0x1d2   : > { %v1359_v19 = vadd.f32 %v1358_v17, %v1357_v15  ;;  %v1054_v42 = vmul.f32 0.015625, %v1037_v34  ;;  %v3625_v15 = vld [vmem:[#allocation10 + $0x18] sm:$0xff]  }
 0x1d4   : > { %v4619_v28 = vmul.f32 %v1359_v19, %v1089_v40  ;;  %v4621_v32 = vmul.f32 %v1359_v19, %v1090_v41  ;;  %v4624_v33 = vmul.f32 %v1359_v19, %v4576_v30  ;;  %v4627_v35 = vmul.f32 %v1359_v19, %v4580_v31  ;;  %v4705_v30 = vld [vmem:[#allocation17 + $0x30] sm:$0xff]   ;;  %v4711_v31 = vld [vmem:[#allocation17 + $0x28] sm:$0xff]  }
 0x1d5   : > { %v4630_v37 = vmul.f32 %v1359_v19, %v4613_v6  ;;  %v4633_v38 = vmul.f32 %v1359_v19, %v4615_v62  ;;  %v4636_v39 = vmul.f32 %v1359_v19, %v4607_v0  ;;  %v1144_v40 = vpack.c.bf16 %v1056_v27, %v1055_v20  ;;  %v4719_v0 = vld [vmem:[#allocation17 + $0x18] sm:$0xff]  }
 0x1d6   : > { %v1368_v41 = vpack.c.bf16 %v4621_v32, %v4619_v28  ;;  %v1367_v43 = vmul.f32 %v1359_v19, %v4609_v1  ;;  %v1369_v44 = vpack.c.bf16 %v4627_v35, %v4624_v33  ;;  %v1143_v48 = vpack.c.bf16 %v1054_v42, %v1053_v25  ;;  %v4723_v1 = vld [vmem:[#allocation17 + $0x10] sm:$0xff]  }
 0x1d7   : > { %v1370_v45 = vpack.c.bf16 %v4633_v38, %v4630_v37  ;;  %3253 = vmatprep.subr.bf16.mxu1 %v1144_v40 }
 0x1d8   : > { %v1371_v49 = vpack.c.bf16 %v1367_v43, %v4636_v39  ;;  %3254 = vmatpush3.bf16.msra.mxu1 %v1144_v40 }
 0x1d9   : > { %3255 = vmatprep.subr.bf16.mxu1 %v1143_v48 }
 0x1dc   : > { %3256 = vmatpush3.bf16.msra.mxu1 %v1143_v48 }
 0x1dd   : > { %3257 = vmatprep.subr.bf16.mxu1 %v1142_v46 }
 0x1e0   : > { %3258 = vmatpush3.bf16.msra.mxu1 %v1142_v46 }
 0x1e1   : > { %3259 = vmatprep.subr.bf16.mxu1 %v1141_v52 }
 0x1e4   : > { %3260 = vmatpush3.bf16.msra.mxu1 %v1141_v52 }
 0x1e5   : > { %3277 = vmatprep.subr.bf16.mxu1 %v4646_v53 }
 0x21e   : > { %v1153_v54 = vpop.trf.xlu0 }
 0x21f   : > { %3261 = vmatprep.mubr.msk.bf16.mxu1 %vm1161_vm0, %v1153_v54 }
 0x222   : > { %v1154_v57 = vpop.trf.xlu0 }
 0x223   : > { %3262 = vmatmul.mubr.msk.bf16.vlgmr.msra.gmra.mxu1 %vm1161_vm0, %v1154_v57  ;;  %v3627_v57 = vld [vmem:[#allocation10 + $0x8] sm:$0xff]  }
 0x224   : > { %3278 = vmatpush3.bf16.msra.mxu1 %v4646_v53 }
 0x225   : > { %3279 = vmatprep.subr.bf16.mxu1 %v4650_v56 }
 0x226   : > { %v1155_v60 = vpop.trf.xlu0 }
 0x227   : > { %3265 = vmatprep.mubr.msk.bf16.mxu1 %vm1161_vm0, %v1155_v60  ;;  %v4703_v60 = vld [vmem:[#allocation17 + $0x38] sm:$0xff]  }
 0x228   : > { %3280 = vmatpush3.bf16.msra.mxu1 %v4650_v56 }
 0x229   : > { %3281 = vmatprep.subr.bf16.mxu1 %v4655_v59 }
 0x22a   : > { %v1156_v63 = vpop.trf.xlu0 }
 0x22b   : > { %3266 = vmatmul.mubr.msk.bf16.gmra.mxu1 %vm1161_vm0, %v1156_v63 }
 0x22c   : > { %3282 = vmatpush3.bf16.msra.mxu1 %v4655_v59 }
 0x22d   : > { %3283 = vmatprep.subr.bf16.mxu1 %v4660_v61 }
 0x22e   : > { %v1157_v2 = vpop.trf.xlu0 }
 0x22f   : > { %3269 = vmatprep.mubr.msk.bf16.mxu1 %vm1161_vm0, %v1157_v2 }
 0x230   : > { %3284 = vmatpush3.bf16.msra.mxu1 %v4660_v61 }
 0x231   : > { %3285 = vmatprep.subr.bf16.mxu1 %v4665_v58 }
 0x232   : > { %v1158_v3 = vpop.trf.xlu0 }
 0x233   : > { %3270 = vmatmul.mubr.msk.bf16.gmra.mxu1 %vm1161_vm0, %v1158_v3 }
 0x234   : > { %3286 = vmatpush3.bf16.msra.mxu1 %v4665_v58 }
 0x235   : > { %3287 = vmatprep.subr.bf16.mxu1 %v4670_v4 }
 0x236   : > { %v1159_v7 = vpop.trf.xlu0 }
 0x237   : > { %3273 = vmatprep.mubr.msk.bf16.mxu1 %vm1161_vm0, %v1159_v7 }
 0x238   : > { %3288 = vmatpush3.bf16.msra.mxu1 %v4670_v4 }
 0x239   : > { %3289 = vmatprep.subr.bf16.mxu1 %v4675_v47 }
 0x23a   : > { %v1160_v9 = vpop.trf.xlu0 }
 0x23b   : > { %3274 = vmatmul.mubr.msk.bf16.gmra.mxu1 %vm1161_vm0, %v1160_v9 }
 0x23c   : > { %3290 = vmatpush3.bf16.msra.mxu1 %v4675_v47  ;;  %3293 = vmatprep.mubr.bf16.mxu1 %v1368_v41 }
 0x23d   : > { %3291 = vmatprep.subr.bf16.mxu1 %v4680_v8 }
 0x240   : > { %3292 = vmatpush3.bf16.msra.mxu1 %v4680_v8 }
 0x241   : > { %3325 = vmatprep.subr.bf16.mxu1 %v3621_v10 }
 0x243   : > { %3294 = vmatmul.mubr.bf16.vlgmr.msra.gmra.mxu1 %v1369_v44 }
 0x244   : > { %3297 = vmatprep.mubr.bf16.mxu1 %v1370_v45  ;;  %3326 = vmatpush3.bf16.msra.mxu1 %v3621_v10 }
 0x245   : > { %3327 = vmatprep.subr.bf16.mxu1 %v3622_v12 }
 0x248   : > { %3328 = vmatpush3.bf16.msra.mxu1 %v3622_v12 }
 0x249   : > { %3329 = vmatprep.subr.bf16.mxu1 %v3623_v13 }
 0x24b   : > { %3298 = vmatmul.mubr.bf16.gmra.mxu1 %v1371_v49 }
 0x24c   : > { %3330 = vmatpush3.bf16.msra.mxu1 %v3623_v13 }
 0x24d   : > { %3331 = vmatprep.subr.bf16.mxu1 %v3624_v14 }
 0x250   : > { %3332 = vmatpush3.bf16.msra.mxu1 %v3624_v14 }
 0x251   : > { %3333 = vmatprep.subr.bf16.mxu1 %v3625_v15 }
 0x254   : > { %3334 = vmatpush3.bf16.msra.mxu1 %v3625_v15 }
 0x2e3   : > { %v3263_v16 = vpop.f32.mrf.mxu1 }
 0x2e5   : > { %v1220_v17 = vpop.f32.mrf.mxu1 }
 0x2e7   : > { %v3264_v18 = vpop.f32.mrf.mxu1 }
 0x2e8   : > { %v1284_v46 = vpack.c.bf16 %v3264_v18, %v3263_v16 }
 0x2e9   : > { %v1223_v19 = vpop.f32.mrf.mxu1 }
 0x2ea   : > { %v1340_v52 = vmul.bf16 %v4675_v47, %v1284_v46 }
 0x2eb   : > { %v3267_v20 = vpop.f32.mrf.mxu1 }
 0x2ed   : > { %v1236_v21 = vpop.f32.mrf.mxu1 }
 0x2ef   : > { %v3268_v22 = vpop.f32.mrf.mxu1 }
 0x2f0   : > { %v1286_v45 = vpack.c.bf16 %v3268_v22, %v3267_v20 }
 0x2f1   : > { %v1239_v25 = vpop.f32.mrf.mxu1 }
 0x2f2   : > { %v1342_v49 = vmul.bf16 %v4665_v58, %v1286_v45  ;;  %v1285_v50 = vpack.c.bf16 %v1239_v25, %v1236_v21 }
 0x2f3   : > { %v3271_v26 = vpop.f32.mrf.mxu1 }
 0x2f4   : > { %v1341_v51 = vmul.bf16 %v4670_v4, %v1285_v50 }
 0x2f5   : > { %v1252_v27 = vpop.f32.mrf.mxu1 }
 0x2f7   : > { %v3272_v28 = vpop.f32.mrf.mxu1 }
 0x2f8   : > { %v1288_v42 = vpack.c.bf16 %v3272_v28, %v3271_v26 }
 0x2f9   : > { %v1255_v32 = vpop.f32.mrf.mxu1 }
 0x2fa   : > { %v1344_v43 = vmul.bf16 %v4655_v59, %v1288_v42  ;;  %v1287_v44 = vpack.c.bf16 %v1255_v32, %v1252_v27  ;;  %v3628_v59 = vld [vmem:[#allocation10] sm:$0xff]  }
 0x2fb   : > { %v3275_v33 = vpop.f32.mrf.mxu1 }
 0x2fc   : > { %v1343_v48 = vmul.bf16 %v4660_v61, %v1287_v44 }
 0x2fd   : > { %v1268_v34 = vpop.f32.mrf.mxu1 }
 0x2ff   : > { %v3276_v35 = vpop.f32.mrf.mxu1 }
 0x300   : > { %v1290_v37 = vpack.c.bf16 %v3276_v35, %v3275_v33 }
 0x301   : > { %v1271_v38 = vpop.f32.mrf.mxu1 }
 0x302   : > { %v1346_v39 = vmul.bf16 %v4646_v53, %v1290_v37  ;;  %v1289_v40 = vpack.c.bf16 %v1271_v38, %v1268_v34  ;;  %v1283_v53 = vpack.c.bf16 %v1223_v19, %v1220_v17 }
 0x304   : > { %v1345_v41 = vmul.bf16 %v4650_v56, %v1289_v40  ;;  %3301 = vmatprep.subr.bf16.mxu0 %v1346_v39  ;;  %v1339_v54 = vmul.bf16 %v4680_v8, %v1283_v53  ;;  %v3626_v56 = vld [vmem:[#allocation10 + $0x10] sm:$0xff]  }
 0x305   : > { %3302 = vmatpush3.bf16.msra.mxu0 %v1346_v39  ;;  %3335 = vmatprep.subr.bf16.mxu1 %v3626_v56 }
 0x306   : > { %3303 = vmatprep.subr.bf16.mxu0 %v1345_v41  ;;  %3336 = vmatpush3.bf16.msra.mxu1 %v3626_v56 }
 0x307   : > { %3337 = vmatprep.subr.bf16.mxu1 %v3627_v57 }
 0x309   : > { %3304 = vmatpush3.bf16.msra.mxu0 %v1345_v41 }
 0x30a   : > { %3305 = vmatprep.subr.bf16.mxu0 %v1344_v43  ;;  %3338 = vmatpush3.bf16.msra.mxu1 %v3627_v57  ;;  %v4739_v57 = vld [vmem:[#allocation17 + $0x8] sm:$0xff]  }
 0x30b   : > { %3339 = vmatprep.subr.bf16.mxu1 %v3628_v59 }
 0x30d   : > { %3306 = vmatpush3.bf16.msra.mxu0 %v1344_v43 }
 0x30e   : > { %3307 = vmatprep.subr.bf16.mxu0 %v1343_v48  ;;  %3340 = vmatpush3.bf16.msra.mxu1 %v3628_v59  ;;  %v4745_v59 = vld [vmem:[#allocation17] sm:$0xff]  }
 0x30f   : > { %3373 = vmatprep.subr.bf16.mxu1 %v4703_v60 }
 0x311   : > { %3308 = vmatpush3.bf16.msra.mxu0 %v1343_v48 }
 0x312   : > { %3309 = vmatprep.subr.bf16.mxu0 %v1342_v49 }
 0x315   : > { %3310 = vmatpush3.bf16.msra.mxu0 %v1342_v49 }
 0x316   : > { %3311 = vmatprep.subr.bf16.mxu0 %v1341_v51 }
 0x319   : > { %3312 = vmatpush3.bf16.msra.mxu0 %v1341_v51 }
 0x31a   : > { %3313 = vmatprep.subr.bf16.mxu0 %v1340_v52 }
 0x31d   : > { %3314 = vmatpush3.bf16.msra.mxu0 %v1340_v52 }
 0x31e   : > { %3315 = vmatprep.subr.bf16.mxu0 %v1339_v54 }
 0x321   : > { %3316 = vmatpush3.bf16.msra.mxu0 %v1339_v54 }
 0x322   : > { %3349 = vmatprep.subr.bf16.mxu0 %v4703_v60 }
 0x324   : > { %3318 = vmatmul.mubr.bf16.vlgmr.msra.gmra.mxu0 %v1454_v36  ;;  %v4715_v36 = vld [vmem:[#allocation17 + $0x20] sm:$0xff]  }
 0x325   : > { %3321 = vmatprep.mubr.bf16.mxu0 %v1455_v55  ;;  %3350 = vmatpush3.bf16.msra.mxu0 %v4703_v60 }
 0x326   : > { %3351 = vmatprep.subr.bf16.mxu0 %v4705_v30 }
 0x329   : > { %3352 = vmatpush3.bf16.msra.mxu0 %v4705_v30 }
 0x32a   : > { %3353 = vmatprep.subr.bf16.mxu0 %v4711_v31 }
 0x32c   : > { %3322 = vmatmul.mubr.bf16.gmra.mxu0 %v1456_v5  ;;  %v3295_v5 = vpop.f32.mrf.mxu1 }
 0x32d   : > { %3354 = vmatpush3.bf16.msra.mxu0 %v4711_v31  ;;  %v1415_v3 = vadd.f32 1e-06, %v3295_v5 }
 0x32e   : > { %3355 = vmatprep.subr.bf16.mxu0 %v4715_v36  ;;  %v1406_v6 = vpop.f32.mrf.mxu1 }
 0x32f   : > { %v1407_v58 = vadd.f32 1e-06, %v1406_v6 }
 0x330   : > { %v3296_v62 = vpop.f32.mrf.mxu1 }
 0x331   : > { %3356 = vmatpush3.bf16.msra.mxu0 %v4715_v36  ;;  %v1418_v2 = vadd.f32 1e-06, %v3296_v62  ;;  %3733 = vrcp.f32 %v1407_v58 }
 0x332   : > { %3357 = vmatprep.subr.bf16.mxu0 %v4719_v0  ;;  %v1409_v55 = vpop.f32.mrf.mxu1 }
 0x333   : > { %v1410_v4 = vadd.f32 1e-06, %v1409_v55  ;;  %3735 = vrcp.f32 %v1418_v2 }
 0x334   : > { %v3299_v61 = vpop.f32.mrf.mxu1 }
 0x335   : > { %3358 = vmatpush3.bf16.msra.mxu0 %v4719_v0  ;;  %3737 = vrcp.f32 %v1410_v4  ;;  %v1431_v12 = vadd.f32 1e-06, %v3299_v61 }
 0x336   : > { %3359 = vmatprep.subr.bf16.mxu0 %v4723_v1  ;;  %v1422_v63 = vpop.f32.mrf.mxu1  ;;  %3739 = vrcp.f32 %v1415_v3 }
 0x337   : > { %v1423_v8 = vadd.f32 1e-06, %v1422_v63 }
 0x338   : > { %v3300_v47 = vpop.f32.mrf.mxu1 }
 0x339   : > { %3360 = vmatpush3.bf16.msra.mxu0 %v4723_v1  ;;  %v1434_v9 = vadd.f32 1e-06, %v3300_v47  ;;  %3741 = vrcp.f32 %v1423_v8  ;;  %v3639_v8 = vld [vmem:[#allocation11 + $0x74] ss:$8 sps:$4 sm:$0xff]  }
 0x33a   : > { %v1425_v7 = vpop.f32.mrf.mxu1  ;;  %3361 = vmatprep.subr.bf16.mxu0 %v4739_v57 }
 0x33b   : > { %v1426_v10 = vadd.f32 1e-06, %v1425_v7  ;;  %3743 = vrcp.f32 %v1434_v9  ;;  %v3643_v9 = vld [vmem:[#allocation13 + $0x70] ss:$8 sps:$4 sm:$0xff]  }
 0x33d   : > { %3745 = vrcp.f32 %v1426_v10  ;;  %3362 = vmatpush3.bf16.msra.mxu0 %v4739_v57  ;;  %v3645_v10 = vld [vmem:[#allocation13 + $0x74] ss:$8 sps:$4 sm:$0xff]  }
 0x33e   : > { %3747 = vrcp.f32 %v1431_v12  ;;  %v3734_v13 = vpop.eup %3733  ;;  %3363 = vmatprep.subr.bf16.mxu0 %v4745_v59 }
 0x33f   : > { %v1522_v21 = vmul.f32 64.0, %v3734_v13 }
 0x340   : > { %v3736_v15 = vpop.eup %3735 }
 0x341   : > { %v1525_v20 = vmul.f32 64.0, %v3736_v15  ;;  %3364 = vmatpush3.bf16.msra.mxu0 %v4745_v59 }
 0x342   : > { %v3738_v16 = vpop.eup %3737  ;;  %2035 = vmatprep.subr.bf16.mxu0 %v3645_v10  ;;  %v3678_v10 = vld [vmem:[#allocation11 + $0x4] ss:$8 sps:$4 sm:$0xff]  }
 0x343   : > { %v3740_v18 = vpop.eup %3739  ;;  %v1523_v22 = vmul.f32 64.0, %v3738_v16 }
 0x344   : > { %v1524_v25 = vmul.f32 64.0, %v3740_v18 }
 0x346   : > { %v3742_v33 = vpop.eup %3741 }
 0x347   : > { %v1526_v45 = vmul.f32 64.0, %v3742_v33 }
 0x348   : > { %v3744_v37 = vpop.eup %3743 }
 0x349   : > { %v1529_v44 = vmul.f32 64.0, %v3744_v37 }
 0x34a   : > { %v3746_v39 = vpop.eup %3745 }
 0x34b   : > { %v3748_v41 = vpop.eup %3747  ;;  %v1527_v48 = vmul.f32 64.0, %v3746_v39 }
 0x34c   : > { %v1528_v49 = vmul.f32 64.0, %v3748_v41  ;;  %v3640_v41 = vld [vmem:[#allocation11 + $0x60] ss:$8 sps:$4 sm:$0xff]  }
 0x3e4   : > { %v3319_v14 = vpop.f32.mrf.mxu0 }
 0x3e5   : > { %v1532_v34 = vmul.f32 %v3319_v14, %v1524_v25 }
 0x3e6   : > { %v1491_v17 = vpop.f32.mrf.mxu0 }
 0x3e7   : > { %v1530_v28 = vmul.f32 %v1522_v21, %v1491_v17 }
 0x3e8   : > { %v3320_v19 = vpop.f32.mrf.mxu0 }
 0x3e9   : > { %v1533_v26 = vmul.f32 %v3320_v19, %v1525_v20 }
 0x3ea   : > { %v1494_v27 = vpop.f32.mrf.mxu0 }
 0x3eb   : > { %v1531_v32 = vmul.f32 %v1523_v22, %v1494_v27  ;;  %v1539_v40 = vpack.c.bf16 %v1533_v26, %v1532_v34 }
 0x3ec   : > { %v3323_v35 = vpop.f32.mrf.mxu0 }
 0x3ed   : > { %v1538_v38 = vpack.c.bf16 %v1531_v32, %v1530_v28  ;;  %v1536_v53 = vmul.f32 %v3323_v35, %v1528_v49  ;;  %v3637_v32 = vld [vmem:[#allocation11 + $0x70] ss:$8 sps:$4 sm:$0xff]   ;;  %v3642_v35 = vld [vmem:[#allocation11 + $0x64] ss:$8 sps:$4 sm:$0xff]  }
 0x3ee   : > { %v1507_v42 = vpop.f32.mrf.mxu0 }
 0x3ef   : > { %3341 = vmatprep.mubr.bf16.mxu1 %v1538_v38  ;;  %v1534_v51 = vmul.f32 %v1526_v45, %v1507_v42 }
 0x3f0   : > { %v3324_v43 = vpop.f32.mrf.mxu0  ;;  %3342 = vmatmul.mubr.bf16.vlgmr.msra.gmra.mxu1 %v1539_v40 }
 0x3f1   : > { %3374 = vmatpush3.bf16.msra.mxu1 %v4703_v60  ;;  %v1537_v50 = vmul.f32 %v3324_v43, %v1529_v44 }
 0x3f2   : > { %v1510_v46 = vpop.f32.mrf.mxu0  ;;  %3375 = vmatprep.subr.bf16.mxu1 %v4705_v30 }
 0x3f3   : > { %v1535_v52 = vmul.f32 %v1527_v48, %v1510_v46  ;;  %v1541_v56 = vpack.c.bf16 %v1537_v50, %v1536_v53  ;;  %v3648_v46 = vld [vmem:[#allocation11 + $0x54] ss:$8 sps:$4 sm:$0xff]   ;;  %v3649_v53 = vld [vmem:[#allocation13 + $0x60] ss:$8 sps:$4 sm:$0xff]  }
 0x3f5   : > { %v1540_v54 = vpack.c.bf16 %v1535_v52, %v1534_v51  ;;  %3376 = vmatpush3.bf16.msra.mxu1 %v4705_v30  ;;  %v3646_v51 = vld [vmem:[#allocation11 + $0x50] ss:$8 sps:$4 sm:$0xff]   ;;  %v3651_v52 = vld [vmem:[#allocation13 + $0x64] ss:$8 sps:$4 sm:$0xff]  }
 0x3f6   : > { %3377 = vmatprep.subr.bf16.mxu1 %v4711_v31 }
 0x3f7   : > { %3345 = vmatprep.mubr.bf16.mxu1 %v1540_v54  ;;  %v3654_v54 = vld [vmem:[#allocation11 + $0x44] ss:$8 sps:$4 sm:$0xff]  }
 0x3f8   : > { %3346 = vmatmul.mubr.bf16.gmra.mxu1 %v1541_v56  ;;  %v3652_v56 = vld [vmem:[#allocation11 + $0x40] ss:$8 sps:$4 sm:$0xff]  }
 0x3f9   : > { %3378 = vmatpush3.bf16.msra.mxu1 %v4711_v31 }
 0x3fa   : > { %3379 = vmatprep.subr.bf16.mxu1 %v4715_v36 }
 0x3fd   : > { %3380 = vmatpush3.bf16.msra.mxu1 %v4715_v36 }
 0x3fe   : > { %3381 = vmatprep.subr.bf16.mxu1 %v4719_v0 }
 0x401   : > { %3382 = vmatpush3.bf16.msra.mxu1 %v4719_v0 }
 0x402   : > { %3383 = vmatprep.subr.bf16.mxu1 %v4723_v1 }
 0x405   : > { %3384 = vmatpush3.bf16.msra.mxu1 %v4723_v1 }
 0x406   : > { %3385 = vmatprep.subr.bf16.mxu1 %v4739_v57 }
 0x409   : > { %3386 = vmatpush3.bf16.msra.mxu1 %v4739_v57 }
 0x40a   : > { %3387 = vmatprep.subr.bf16.mxu1 %v4745_v59 }
 0x40d   : > { %3388 = vmatpush3.bf16.msra.mxu1 %v4745_v59 }
 0x40e   : > { %2188 = vmatprep.subr.bf16.mxu1 %v3639_v8  ;;  %v3675_v8 = vld [vmem:[#allocation13 + $0x24] ss:$8 sps:$4 sm:$0xff]  }
 0x4b0   : > { %v3343_v5 = vpop.f32.mrf.mxu1 }
 0x4b2   : > { %v1640_v6 = vpop.f32.mrf.mxu1 }
 0x4b4   : > { %v3344_v62 = vpop.f32.mrf.mxu1 }
 0x4b5   : > { %v1674_v63 = vpack.c.bf16 %v3344_v62, %v3343_v5 }
 0x4b6   : > { %v1643_v55 = vpop.f32.mrf.mxu1 }
 0x4b7   : > { %v1673_v61 = vpack.c.bf16 %v1643_v55, %v1640_v6 }
 0x4b8   : > { %v3347_v58 = vpop.f32.mrf.mxu1 }
 0x4b9   : > { %3365 = vmatprep.mubr.bf16.mxu0 %v1673_v61  ;;  %v3663_v61 = vld [vmem:[#allocation13 + $0x44] ss:$8 sps:$4 sm:$0xff]  }
 0x4ba   : > { %v1656_v2 = vpop.f32.mrf.mxu1  ;;  %3366 = vmatmul.mubr.bf16.vlgmr.msra.gmra.mxu0 %v1674_v63  ;;  %v3661_v63 = vld [vmem:[#allocation13 + $0x40] ss:$8 sps:$4 sm:$0xff]  }
 0x4bb   : > { %2036 = vmatpush1.bf16.msra.mxu0 %v3643_v9  ;;  %v3673_v9 = vld [vmem:[#allocation13 + $0x20] ss:$8 sps:$4 sm:$0xff]  }
 0x4bc   : > { %v3348_v4 = vpop.f32.mrf.mxu1  ;;  %2037 = vmatprep.subr.bf16.mxu0 %v3651_v52 }
 0x4bd   : > { %v1676_v7 = vpack.c.bf16 %v3348_v4, %v3347_v58 }
 0x4be   : > { %v1659_v3 = vpop.f32.mrf.mxu1 }
 0x4bf   : > { %v1675_v47 = vpack.c.bf16 %v1659_v3, %v1656_v2  ;;  %2038 = vmatpush1.bf16.msra.mxu0 %v3649_v53 }
 0x4c1   : > { %3369 = vmatprep.mubr.bf16.mxu0 %v1675_v47  ;;  %v3672_v47 = vld [vmem:[#allocation11 + $0x14] ss:$8 sps:$4 sm:$0xff]  }
 0x4c2   : > { %3370 = vmatmul.mubr.bf16.gmra.mxu0 %v1676_v7  ;;  %v3670_v7 = vld [vmem:[#allocation11 + $0x10] ss:$8 sps:$4 sm:$0xff]  }
 0x57a   : > { %v3367_v12 = vpop.f32.mrf.mxu0 }
 0x57b   : > { %v4755_v17 = vsub.f32 %v3343_v5, %v3367_v12  ;;  %v3657_v5 = vld [vmem:[#allocation13 + $0x54] ss:$8 sps:$4 sm:$0xff]   ;;  %v3676_v12 = vld [vmem:[#allocation11] ss:$8 sps:$4 sm:$0xff]  }
 0x57c   : > { %v1759_v13 = vpop.f32.mrf.mxu0  ;;  %2039 = vmatprep.subr.bf16.mxu0 %v3657_v5 }
 0x57d   : > { %v4751_v15 = vsub.f32 %v1640_v6, %v1759_v13  ;;  %v1800_v26 = vmul.f32 %v4755_v17, %v4755_v17  ;;  %v3655_v6 = vld [vmem:[#allocation13 + $0x50] ss:$8 sps:$4 sm:$0xff]  }
 0x57e   : > { %v3368_v14 = vpop.f32.mrf.mxu0  ;;  %2040 = vmatpush1.bf16.msra.mxu0 %v3655_v6  ;;  %v3679_v13 = vld [vmem:[#allocation13 + $0x10] ss:$8 sps:$4 sm:$0xff]  }
 0x57f   : > { %v4753_v16 = vsub.f32 %v3344_v62, %v3368_v14  ;;  %v1798_v22 = vmul.f32 %v4751_v15, %v4751_v15  ;;  %v3660_v62 = vld [vmem:[#allocation11 + $0x34] ss:$8 sps:$4 sm:$0xff]   ;;  %2041 = vmatprep.subr.bf16.mxu0 %v3663_v61 }
 0x580   : > { %v1762_v18 = vpop.f32.mrf.mxu0  ;;  %v3681_v14 = vld [vmem:[#allocation13 + $0x14] ss:$8 sps:$4 sm:$0xff]  }
 0x581   : > { %v4757_v19 = vsub.f32 %v1643_v55, %v1762_v18  ;;  %v1801_v20 = vmul.f32 %v4753_v16, %v4753_v16  ;;  %v3658_v55 = vld [vmem:[#allocation11 + $0x30] ss:$8 sps:$4 sm:$0xff]   ;;  %v4151_v18 = vmov 0  }
 0x582   : > { %v3371_v21 = vpop.f32.mrf.mxu0  ;;  %2042 = vmatpush1.bf16.msra.mxu0 %v3661_v63  ;;  %2067 = vmatprep.mubr.bf16.mxu0 %v4151_v18 }
 0x583   : > { %v1799_v25 = vmul.f32 %v4757_v19, %v4757_v19  ;;  %v1807_v33 = vpack.c.bf16 %v1801_v20, %v1800_v26  ;;  %v4771_v39 = vsub.f32 %v3347_v58, %v3371_v21  ;;  %v3666_v58 = vld [vmem:[#allocation11 + $0x24] ss:$8 sps:$4 sm:$0xff]   ;;  %v3682_v21 = vld [vmem:[#allocation13] ss:$8 sps:$4 sm:$0xff]  }
 0x584   : > { %v1775_v27 = vpop.f32.mrf.mxu0  ;;  %v3684_v20 = vld [vmem:[#allocation13 + $0x4] ss:$8 sps:$4 sm:$0xff]  }
 0x585   : > { %v1806_v28 = vpack.c.bf16 %v1799_v25, %v1798_v22  ;;  %v4767_v37 = vsub.f32 %v1656_v2, %v1775_v27  ;;  %v1804_v48 = vmul.f32 %v4771_v39, %v4771_v39  ;;  %v3664_v2 = vld [vmem:[#allocation11 + $0x20] ss:$8 sps:$4 sm:$0xff]  }
 0x586   : > { %v3372_v34 = vpop.f32.mrf.mxu0 }
 0x587   : > { %v4769_v38 = vsub.f32 %v3348_v4, %v3372_v34  ;;  %3389 = vmatprep.mubr.bf16.mxu1 %v1806_v28  ;;  %v1802_v44 = vmul.f32 %v4767_v37, %v4767_v37  ;;  %v3669_v4 = vld [vmem:[#allocation13 + $0x34] ss:$8 sps:$4 sm:$0xff]  }
 0x588   : > { %v1778_v40 = vpop.f32.mrf.mxu0  ;;  %3390 = vmatmul.mubr.bf16.vlgmr.msra.gmra.mxu1 %v1807_v33  ;;  %2043 = vmatprep.subr.bf16.mxu0 %v3669_v4 }
 0x589   : > { %v4773_v42 = vsub.f32 %v1659_v3, %v1778_v40  ;;  %2189 = vmatpush1.bf16.msra.mxu1 %v3637_v32  ;;  %v1805_v43 = vmul.f32 %v4769_v38, %v4769_v38  ;;  %v3667_v3 = vld [vmem:[#allocation13 + $0x30] ss:$8 sps:$4 sm:$0xff]  }
 0x58a   : > { %2190 = vmatprep.subr.bf16.mxu1 %v3642_v35  ;;  %2044 = vmatpush1.bf16.msra.mxu0 %v3667_v3 }
 0x58b   : > { %v1803_v45 = vmul.f32 %v4773_v42, %v4773_v42  ;;  %v1809_v50 = vpack.c.bf16 %v1805_v43, %v1804_v48  ;;  %2045 = vmatprep.subr.bf16.mxu0 %v3675_v8 }
 0x58d   : > { %v1808_v49 = vpack.c.bf16 %v1803_v45, %v1802_v44  ;;  %2191 = vmatpush1.bf16.msra.mxu1 %v3640_v41 }
 0x58e   : > { %2192 = vmatprep.subr.bf16.mxu1 %v3648_v46  ;;  %2046 = vmatpush1.bf16.msra.mxu0 %v3673_v9  ;;  %v3690_v9 = vld [vmem:[#allocation14 + $0x28] sm:$0xff]  }
 0x58f   : > { %3393 = vmatprep.mubr.bf16.mxu1 %v1808_v49  ;;  %2047 = vmatprep.subr.bf16.mxu0 %v3681_v14 }
 0x590   : > { %3394 = vmatmul.mubr.bf16.gmra.mxu1 %v1809_v50  ;;  %v2950_v50 = vld [vmem:[%s4947_s10] ss:$0 sm:$0xff] }
 0x591   : > { %2193 = vmatpush1.bf16.msra.mxu1 %v3646_v51  ;;  %2220 = vmatprep.mubr.bf16.mxu1 %v4151_v18 }
 0x592   : > { %2194 = vmatprep.subr.bf16.mxu1 %v3654_v54  ;;  %2048 = vmatpush1.bf16.msra.mxu0 %v3679_v13  ;;  %v3691_v13 = vld [vmem:[#allocation14 + $0x60] sm:$0xff]  }
 0x593   : > { %2049 = vmatprep.subr.bf16.mxu0 %v3684_v20 }
 0x595   : > { %2195 = vmatpush1.bf16.msra.mxu1 %v3652_v56 }
 0x596   : > { %2196 = vmatprep.subr.bf16.mxu1 %v3660_v62  ;;  %2050 = vmatpush1.bf16.msra.mxu0 %v3682_v21 }
 0x599   : > { %2197 = vmatpush1.bf16.msra.mxu1 %v3658_v55  ;;  %v3686_v55 = vld [vmem:[#allocation14 + $0x38] sm:$0xff]  }
 0x59a   : > { %2198 = vmatprep.subr.bf16.mxu1 %v3666_v58 }
 0x59d   : > { %2199 = vmatpush1.bf16.msra.mxu1 %v3664_v2 }
 0x59e   : > { %2200 = vmatprep.subr.bf16.mxu1 %v3672_v47 }
 0x5a1   : > { %2201 = vmatpush1.bf16.msra.mxu1 %v3670_v7  ;;  %v3689_v7 = vld [vmem:[#allocation14 + $0x68] sm:$0xff]  }
 0x5a2   : > { %2202 = vmatprep.subr.bf16.mxu1 %v3678_v10 }
 0x5a5   : > { %2203 = vmatpush1.bf16.msra.mxu1 %v3676_v12 }
 0x5a6   : > { %3397 = vmatprep.subr.bf16.mxu1 %v4703_v60 }
 0x5a8   : > { %2221 = vmatmul.mubr.bf16.vlgmr.msra.gmra.mxu1 %v4484_v11  ;;  %v3685_v11 = vld [vmem:[#allocation14 + $0x78] sm:$0xff]  }
 0x5a9   : > { %2230 = vmatprep.mubr.bf16.mxu1 %v4151_v18  ;;  %3398 = vmatpush3.bf16.msra.mxu1 %v4703_v60 }
 0x5aa   : > { %3399 = vmatprep.subr.bf16.mxu1 %v4705_v30  ;;  %3117 = vmatprep.subr.bf16.mxu0 %v3685_v11  ;;  %v3692_v11 = vld [vmem:[#allocation14 + $0x20] sm:$0xff]  }
 0x5ad   : > { %3400 = vmatpush3.bf16.msra.mxu1 %v4705_v30 }
 0x5ae   : > { %3401 = vmatprep.subr.bf16.mxu1 %v4711_v31 }
 0x5b0   : > { %2231 = vmatmul.mubr.bf16.gmra.mxu1 %v4492_v23 }
 0x5b1   : > { %2240 = vmatprep.mubr.bf16.mxu1 %v4151_v18  ;;  %3402 = vmatpush3.bf16.msra.mxu1 %v4711_v31 }
 0x5b2   : > { %3403 = vmatprep.subr.bf16.mxu1 %v4715_v36 }
 0x5b5   : > { %3404 = vmatpush3.bf16.msra.mxu1 %v4715_v36 }
 0x5b6   : > { %3405 = vmatprep.subr.bf16.mxu1 %v4719_v0 }
 0x5b8   : > { %2241 = vmatmul.mubr.bf16.gmra.mxu1 %v4494_v24 }
 0x5b9   : > { %2250 = vmatprep.mubr.bf16.mxu1 %v4151_v18  ;;  %3406 = vmatpush3.bf16.msra.mxu1 %v4719_v0 }
 0x5ba   : > { %3407 = vmatprep.subr.bf16.mxu1 %v4723_v1 }
 0x5bd   : > { %3408 = vmatpush3.bf16.msra.mxu1 %v4723_v1 }
 0x5be   : > { %3409 = vmatprep.subr.bf16.mxu1 %v4739_v57 }
 0x5c0   : > { %2251 = vmatmul.mubr.bf16.gmra.mxu1 %v4500_v29 }
 0x5c1   : > { %3410 = vmatpush3.bf16.msra.mxu1 %v4739_v57 }
 0x5c2   : > { %3411 = vmatprep.subr.bf16.mxu1 %v4745_v59 }
 0x5c5   : > { %3412 = vmatpush3.bf16.msra.mxu1 %v4745_v59 }
 0x648   : > { %v3391_v23 = vpop.f32.mrf.mxu1 }
 0x649   : > { %v1853_v28 = vadd.f32 1e-05, %v3391_v23 }
 0x64a   : > { %v1844_v24 = vpop.f32.mrf.mxu1 }
 0x64b   : > { %v1845_v22 = vadd.f32 1e-05, %v1844_v24  ;;  %v3693_v24 = vld [vmem:[#allocation14 + $0x58] sm:$0xff]  }
 0x64c   : > { %v3392_v25 = vpop.f32.mrf.mxu1 }
 0x64d   : > { %3749 = vrsqrt.f32 %v1845_v22  ;;  %v1856_v26 = vadd.f32 1e-05, %v3392_v25  ;;  %v3694_v25 = vld [vmem:[#allocation14 + $0x18] sm:$0xff]  }
 0x64e   : > { %v1847_v27 = vpop.f32.mrf.mxu1 }
 0x64f   : > { %v1848_v32 = vadd.f32 1e-05, %v1847_v27  ;;  %3751 = vrsqrt.f32 %v1856_v26 }
 0x650   : > { %v3395_v33 = vpop.f32.mrf.mxu1 }
 0x651   : > { %3753 = vrsqrt.f32 %v1848_v32  ;;  %v1869_v51 = vadd.f32 1e-05, %v3395_v33 }
 0x652   : > { %v1860_v29 = vpop.f32.mrf.mxu1  ;;  %3755 = vrsqrt.f32 %v1853_v28 }
 0x653   : > { %v1861_v40 = vadd.f32 1e-05, %v1860_v29 }
 0x654   : > { %v3396_v34 = vpop.f32.mrf.mxu1 }
 0x655   : > { %v1872_v48 = vadd.f32 1e-05, %v3396_v34  ;;  %v3696_v34 = vld [vmem:[#allocation14 + $0x10] sm:$0xff]  }
 0x656   : > { %v1863_v35 = vpop.f32.mrf.mxu1 }
 0x657   : > { %v1864_v41 = vadd.f32 1e-05, %v1863_v35  ;;  %v3697_v35 = vld [vmem:[#allocation14 + $0x48] sm:$0xff]  }
 0x659   : > { %3757 = vrsqrt.f32 %v1864_v41  ;;  %v3700_v41 = vld [vmem:[#allocation14] sm:$0xff]  }
 0x65a   : > { %v3750_v43 = vpop.eup %3749  ;;  %3759 = vrsqrt.f32 %v1861_v40  ;;  %v3699_v40 = vld [vmem:[#allocation14 + $0x40] sm:$0xff]  }
 0x65b   : > { %v1883_v44 = vmul.f32 %v3750_v43, %v4751_v15  ;;  %3761 = vrsqrt.f32 %v1872_v48  ;;  %v2951_v15 = vld [vmem:[%s4948_s11] ss:$0 sm:$0xff] }
 0x65c   : > { %v3752_v45 = vpop.eup %3751  ;;  %3763 = vrsqrt.f32 %v1869_v51 }
 0x65d   : > { %v1897_v52 = vmul.f32 %v2950_v50, %v1883_v44  ;;  %v1886_v56 = vmul.f32 %v3752_v45, %v4753_v16  ;;  %v3688_v16 = vld [vmem:[#allocation14 + $0x30] sm:$0xff]  }
 0x65e   : > { %v3754_v49 = vpop.eup %3753 }
 0x65f   : > { %v1884_v46 = vmul.f32 %v3754_v49, %v4757_v19  ;;  %v3756_v53 = vpop.eup %3755  ;;  %v1911_v5 = vadd.f32 %v2951_v15, %v1897_v52  ;;  %v1900_v63 = vmul.f32 %v2950_v50, %v1886_v56  ;;  %v3687_v19 = vld [vmem:[#allocation14 + $0x70] sm:$0xff]  }
 0x660   : > { %v1885_v62 = vmul.f32 %v3756_v53, %v4755_v17 }
 0x661   : > { %v1898_v54 = vmul.f32 %v2950_v50, %v1884_v46  ;;  %v1914_v3 = vadd.f32 %v2951_v15, %v1900_v63 }
 0x662   : > { %v1899_v2 = vmul.f32 %v2950_v50, %v1885_v62 }
 0x663   : > { %v1912_v6 = vadd.f32 %v2951_v15, %v1898_v54 }
 0x664   : > { %v1913_v8 = vadd.f32 %v2951_v15, %v1899_v2 }
 0x665   : > { %v1935_v61 = vpack.c.bf16 %v1912_v6, %v1911_v5 }
 0x666   : > { %v3758_v58 = vpop.eup %3757  ;;  %v1936_v10 = vpack.c.bf16 %v1914_v3, %v1913_v8 }
 0x667   : > { %2068 = vmatmul.mubr.bf16.vlgmr.msra.gmra.mxu0 %v1935_v61  ;;  %v3760_v4 = vpop.eup %3759  ;;  %v1888_v47 = vmul.f32 %v3758_v58, %v4773_v42 }
 0x668   : > { %2077 = vmatprep.mubr.bf16.mxu0 %v4151_v18  ;;  %3118 = vmatpush3.bf16.msra.mxu0 %v3686_v55  ;;  %v1887_v17 = vmul.f32 %v3760_v4, %v4767_v37  ;;  %v3762_v14 = vpop.eup %3761 }
 0x669   : > { %3119 = vmatprep.subr.bf16.mxu0 %v3687_v19  ;;  %v1902_v12 = vmul.f32 %v2950_v50, %v1888_v47  ;;  %v3764_v21 = vpop.eup %3763  ;;  %v1890_v23 = vmul.f32 %v3762_v14, %v4769_v38  ;;  %v3695_v38 = vld [vmem:[#allocation14 + $0x50] sm:$0xff]  }
 0x66a   : > { %v1901_v20 = vmul.f32 %v2950_v50, %v1887_v17  ;;  %v1889_v22 = vmul.f32 %v3764_v21, %v4771_v39  ;;  %v3698_v39 = vld [vmem:[#allocation14 + $0x8] sm:$0xff]  }
 0x66b   : > { %v1916_v42 = vadd.f32 %v2951_v15, %v1902_v12  ;;  %v1904_v27 = vmul.f32 %v2950_v50, %v1890_v23 }
 0x66c   : > { %3120 = vmatpush3.bf16.msra.mxu0 %v3688_v16  ;;  %v1915_v37 = vadd.f32 %v2951_v15, %v1901_v20  ;;  %v1903_v28 = vmul.f32 %v2950_v50, %v1889_v22 }
 0x66d   : > { %3121 = vmatprep.subr.bf16.mxu0 %v3689_v7  ;;  %v1918_v32 = vadd.f32 %v2951_v15, %v1904_v27 }
 0x66e   : > { %v1937_v26 = vpack.c.bf16 %v1916_v42, %v1915_v37  ;;  %v1917_v33 = vadd.f32 %v2951_v15, %v1903_v28 }
 0x66f   : > { %2078 = vmatmul.mubr.bf16.gmra.mxu0 %v1936_v10 }
 0x670   : > { %2087 = vmatprep.mubr.bf16.mxu0 %v4151_v18  ;;  %3122 = vmatpush3.bf16.msra.mxu0 %v3690_v9  ;;  %v1938_v29 = vpack.c.bf16 %v1918_v32, %v1917_v33 }
 0x671   : > { %3123 = vmatprep.subr.bf16.mxu0 %v3691_v13 }
 0x674   : > { %3124 = vmatpush3.bf16.msra.mxu0 %v3692_v11 }
 0x675   : > { %3125 = vmatprep.subr.bf16.mxu0 %v3693_v24 }
 0x677   : > { %2088 = vmatmul.mubr.bf16.gmra.mxu0 %v1937_v26 }
 0x678   : > { %2097 = vmatprep.mubr.bf16.mxu0 %v4151_v18  ;;  %3126 = vmatpush3.bf16.msra.mxu0 %v3694_v25  ;;  %v2222_v18 = vpop.f32.mrf.mxu1 }
 0x679   : > { %3127 = vmatprep.subr.bf16.mxu0 %v3695_v38 }
 0x67a   : > { %v2224_v43 = vpop.f32.mrf.mxu1 }
 0x67c   : > { %3128 = vmatpush3.bf16.msra.mxu0 %v3696_v34  ;;  %v2226_v44 = vpop.f32.mrf.mxu1 }
 0x67d   : > { %3129 = vmatprep.subr.bf16.mxu0 %v3697_v35 }
 0x67e   : > { %v2228_v45 = vpop.f32.mrf.mxu1 }
 0x67f   : > { %2098 = vmatmul.mubr.bf16.gmra.mxu0 %v1938_v29 }
 0x680   : > { %3130 = vmatpush3.bf16.msra.mxu0 %v3698_v39  ;;  %v2232_v48 = vpop.f32.mrf.mxu1 }
 0x681   : > { %3131 = vmatprep.subr.bf16.mxu0 %v3699_v40 }
 0x682   : > { %v2234_v49 = vpop.f32.mrf.mxu1 }
 0x684   : > { %3132 = vmatpush3.bf16.msra.mxu0 %v3700_v41  ;;  %v2236_v50 = vpop.f32.mrf.mxu1 }
 0x685   : > { %3421 = vmatprep.subr.bf16.mxu0 %v4703_v60 }
 0x686   : > { %v2238_v46 = vpop.f32.mrf.mxu1 }
 0x688   : > { %v2242_v53 = vpop.f32.mrf.mxu1 }
 0x68a   : > { %v2244_v62 = vpop.f32.mrf.mxu1 }
 0x68c   : > { %v2246_v16 = vpop.f32.mrf.mxu1 }
 0x68e   : > { %v2248_v12 = vpop.f32.mrf.mxu1 }
 0x690   : > { %v2252_v24 = vpop.f32.mrf.mxu1 }
 0x692   : > { %v2254_v28 = vpop.f32.mrf.mxu1 }
 0x694   : > { %v2256_v39 = vpop.f32.mrf.mxu1 }
 0x727   : > { %v2069_v51 = vpop.f32.mrf.mxu0 }
 0x728   : > { %v2223_v5 = vadd.f32 %v2222_v18, %v2069_v51 }
 0x729   : > { %v2071_v52 = vpop.f32.mrf.mxu0 }
 0x72a   : > { %v2225_v56 = vadd.f32 %v2224_v43, %v2071_v52  ;;  %v2261_v2 = vmax.f32 %v2223_v5, 0.0 }
 0x72b   : > { %v2073_v54 = vpop.f32.mrf.mxu0 }
 0x72c   : > { %v2227_v15 = vadd.f32 %v2226_v44, %v2073_v54  ;;  %v2262_v19 = vmax.f32 %v2225_v56, 0.0 }
 0x72d   : > { %v2075_v6 = vpop.f32.mrf.mxu0 }
 0x72e   : > { %v2229_v55 = vadd.f32 %v2228_v45, %v2075_v6  ;;  %v2263_v61 = vmax.f32 %v2227_v15, 0.0 }
 0x72f   : > { %v2079_v63 = vpop.f32.mrf.mxu0 }
 0x730   : > { %v2264_v58 = vmax.f32 %v2229_v55, 0.0  ;;  %v2277_v47 = vpack.c.bf16 %v2263_v61, %v2261_v2  ;;  %v2233_v9 = vadd.f32 %v2232_v48, %v2079_v63  ;;  %v2258_v48 = vpop.f32.mrf.mxu1 }
 0x731   : > { %v2081_v4 = vpop.f32.mrf.mxu0 }
 0x732   : > { %v2278_v3 = vpack.c.bf16 %v2264_v58, %v2262_v19  ;;  %v2235_v8 = vadd.f32 %v2234_v49, %v2081_v4  ;;  %v2265_v42 = vmax.f32 %v2233_v9, 0.0 }
 0x733   : > { %v2083_v7 = vpop.f32.mrf.mxu0 }
 0x734   : > { %v2237_v17 = vadd.f32 %v2236_v50, %v2083_v7  ;;  %2445 = vmatprep.mubr.bf16.mxu0 %v2278_v3  ;;  %v2266_v21 = vmax.f32 %v2235_v8, 0.0 }
 0x735   : > { %v2085_v10 = vpop.f32.mrf.mxu0  ;;  %2446 = vmatmul.mubr.bf16.vlgmr.msra.gmra.mxu0 %v2277_v47 }
 0x736   : > { %v2239_v13 = vadd.f32 %v2238_v46, %v2085_v10  ;;  %3422 = vmatpush3.bf16.msra.mxu0 %v4703_v60  ;;  %v2267_v14 = vmax.f32 %v2237_v17, 0.0 }
 0x737   : > { %v2089_v20 = vpop.f32.mrf.mxu0  ;;  %3423 = vmatprep.subr.bf16.mxu0 %v4705_v30 }
 0x738   : > { %v2268_v11 = vmax.f32 %v2239_v13, 0.0  ;;  %v2279_v22 = vpack.c.bf16 %v2267_v14, %v2265_v42  ;;  %v2243_v60 = vadd.f32 %v2242_v53, %v2089_v20 }
 0x739   : > { %v2091_v23 = vpop.f32.mrf.mxu0 }
 0x73a   : > { %v2280_v37 = vpack.c.bf16 %v2268_v11, %v2266_v21  ;;  %3424 = vmatpush3.bf16.msra.mxu0 %v4705_v30  ;;  %v2245_v26 = vadd.f32 %v2244_v62, %v2091_v23  ;;  %v2269_v35 = vmax.f32 %v2243_v60, 0.0 }
 0x73b   : > { %v2093_v25 = vpop.f32.mrf.mxu0  ;;  %3425 = vmatprep.subr.bf16.mxu0 %v4711_v31 }
 0x73c   : > { %v2247_v27 = vadd.f32 %v2246_v16, %v2093_v25  ;;  %2453 = vmatprep.mubr.bf16.mxu0 %v2280_v37  ;;  %v2270_v34 = vmax.f32 %v2245_v26, 0.0 }
 0x73d   : > { %v2095_v32 = vpop.f32.mrf.mxu0  ;;  %2454 = vmatmul.mubr.bf16.gmra.mxu0 %v2279_v22 }
 0x73e   : > { %v2249_v33 = vadd.f32 %v2248_v12, %v2095_v32  ;;  %3426 = vmatpush3.bf16.msra.mxu0 %v4711_v31  ;;  %v2271_v29 = vmax.f32 %v2247_v27, 0.0 }
 0x73f   : > { %v2099_v38 = vpop.f32.mrf.mxu0  ;;  %3427 = vmatprep.subr.bf16.mxu0 %v4715_v36 }
 0x740   : > { %v2272_v30 = vmax.f32 %v2249_v33, 0.0  ;;  %v2281_v18 = vpack.c.bf16 %v2271_v29, %v2269_v35  ;;  %v2253_v31 = vadd.f32 %v2252_v24, %v2099_v38 }
 0x741   : > { %v2101_v40 = vpop.f32.mrf.mxu0 }
 0x742   : > { %v2282_v41 = vpack.c.bf16 %v2272_v30, %v2270_v34  ;;  %3428 = vmatpush3.bf16.msra.mxu0 %v4715_v36  ;;  %v2255_v44 = vadd.f32 %v2254_v28, %v2101_v40  ;;  %v2273_v36 = vmax.f32 %v2253_v31, 0.0 }
 0x743   : > { %v2103_v43 = vpop.f32.mrf.mxu0  ;;  %3429 = vmatprep.subr.bf16.mxu0 %v4719_v0 }
 0x744   : > { %v2257_v45 = vadd.f32 %v2256_v39, %v2103_v43  ;;  %2461 = vmatprep.mubr.bf16.mxu0 %v2282_v41  ;;  %v2274_v51 = vmax.f32 %v2255_v44, 0.0 }
 0x745   : > { %v2105_v49 = vpop.f32.mrf.mxu0  ;;  %2462 = vmatmul.mubr.bf16.gmra.mxu0 %v2281_v18 }
 0x746   : > { %v2259_v50 = vadd.f32 %v2258_v48, %v2105_v49  ;;  %3430 = vmatpush3.bf16.msra.mxu0 %v4719_v0  ;;  %v2275_v46 = vmax.f32 %v2257_v45, 0.0 }
 0x747   : > { %3431 = vmatprep.subr.bf16.mxu0 %v4723_v1 }
 0x748   : > { %v2276_v52 = vmax.f32 %v2259_v50, 0.0  ;;  %v2283_v54 = vpack.c.bf16 %v2275_v46, %v2273_v36 }
 0x74a   : > { %v2284_v53 = vpack.c.bf16 %v2276_v52, %v2274_v51  ;;  %3432 = vmatpush3.bf16.msra.mxu0 %v4723_v1 }
 0x74b   : > { %3433 = vmatprep.subr.bf16.mxu0 %v4739_v57 }
 0x74c   : > { %2469 = vmatprep.mubr.bf16.mxu0 %v2284_v53 }
 0x74d   : > { %2470 = vmatmul.mubr.bf16.gmra.mxu0 %v2283_v54 }
 0x74e   : > { %3434 = vmatpush3.bf16.msra.mxu0 %v4739_v57 }
 0x74f   : > { %3435 = vmatprep.subr.bf16.mxu0 %v4745_v59 }
 0x752   : > { %3436 = vmatpush3.bf16.msra.mxu0 %v4745_v59 }
 0x7f5   : > { %v3133_v0 = vpop.f32.mrf.mxu0 }
 0x7f7   : > { %v3134_v56 = vpop.f32.mrf.mxu0 }
 0x7f8   : > { %v3135_v6 = vadd.f32 %v3134_v56, %v3133_v0  ;;  %v3000_v56 = vld [vmem:[%s4949_s12] ss:$0 sm:$0xff] }
 0x7f9   : > { %v3136_v15 = vpop.f32.mrf.mxu0 }
 0x7fb   : > { %v3137_v5 = vpop.f32.mrf.mxu0 }
 0x7fc   : > { %v3138_v62 = vadd.f32 %v3137_v5, %v3136_v15 }
 0x7fd   : > { %v3139_v55 = vpop.f32.mrf.mxu0 }
 0x7fe   : > { %v2480_v61 = vpack.c.bf16 %v3138_v62, %v3135_v6 }
 0x7ff   : > { %v3140_v1 = vpop.f32.mrf.mxu0 }
 0x800   : > { %3413 = vmatprep.mubr.bf16.mxu1 %v2480_v61  ;;  %v3141_v58 = vadd.f32 %v3140_v1, %v3139_v55  ;;  %v3001_v55 = vld [vmem:[%s4950_s13] ss:$0 sm:$0xff] }
 0x801   : > { %v3142_v63 = vpop.f32.mrf.mxu0 }
 0x803   : > { %v3143_v19 = vpop.f32.mrf.mxu0 }
 0x804   : > { %v3144_v2 = vadd.f32 %v3143_v19, %v3142_v63 }
 0x805   : > { %v3145_v4 = vpop.f32.mrf.mxu0 }
 0x806   : > { %v2481_v57 = vpack.c.bf16 %v3144_v2, %v3141_v58 }
 0x807   : > { %v3146_v16 = vpop.f32.mrf.mxu0 }
 0x808   : > { %3414 = vmatmul.mubr.bf16.vlgmr.msra.gmra.mxu1 %v2481_v57  ;;  %v3147_v47 = vadd.f32 %v3146_v16, %v3145_v4 }
 0x809   : > { %v3148_v3 = vpop.f32.mrf.mxu0 }
 0x80b   : > { %v3149_v59 = vpop.f32.mrf.mxu0 }
 0x80c   : > { %v3150_v7 = vadd.f32 %v3149_v59, %v3148_v3 }
 0x80d   : > { %v3151_v8 = vpop.f32.mrf.mxu0 }
 0x80e   : > { %v2482_v17 = vpack.c.bf16 %v3150_v7, %v3147_v47 }
 0x80f   : > { %v3152_v9 = vpop.f32.mrf.mxu0 }
 0x810   : > { %3417 = vmatprep.mubr.bf16.mxu1 %v2482_v17  ;;  %v3153_v13 = vadd.f32 %v3152_v9, %v3151_v8 }
 0x811   : > { %v3154_v10 = vpop.f32.mrf.mxu0 }
 0x813   : > { %v3155_v12 = vpop.f32.mrf.mxu0 }
 0x814   : > { %v3156_v14 = vadd.f32 %v3155_v12, %v3154_v10 }
 0x816   : > { %v2483_v20 = vpack.c.bf16 %v3156_v14, %v3153_v13 }
 0x818   : > { %3418 = vmatmul.mubr.bf16.gmra.mxu1 %v2483_v20 }
 0x8c8   : > { %v3415_v21 = vpop.f32.mrf.mxu1 }
 0x8c9   : > { %v2551_v37 = vsub.f32 %v3141_v58, %v3415_v21 }
 0x8ca   : > { %v2518_v11 = vpop.f32.mrf.mxu1 }
 0x8cb   : > { %v2549_v23 = vsub.f32 %v3135_v6, %v2518_v11  ;;  %v2559_v28 = vmul.f32 %v2551_v37, %v2551_v37  ;;  %v3783_v11 = vld [vmem:[%s4456_s23 + $0x18] sm:$0xff] }
 0x8cc   : > { %v3416_v42 = vpop.f32.mrf.mxu1 }
 0x8cd   : > { %v2552_v24 = vsub.f32 %v3144_v2, %v3416_v42  ;;  %v2557_v27 = vmul.f32 %v2549_v23, %v2549_v23 }
 0x8ce   : > { %v2521_v22 = vpop.f32.mrf.mxu1 }
 0x8cf   : > { %v2550_v25 = vsub.f32 %v3138_v62, %v2521_v22  ;;  %v2560_v26 = vmul.f32 %v2552_v24, %v2552_v24 }
 0x8d1   : > { %v2558_v60 = vmul.f32 %v2550_v25, %v2550_v25  ;;  %v2566_v33 = vpack.c.bf16 %v2560_v26, %v2559_v28 }
 0x8d3   : > { %v2565_v32 = vpack.c.bf16 %v2558_v60, %v2557_v27 }
 0x8d5   : > { %3437 = vmatprep.mubr.bf16.mxu0 %v2565_v32 }
 0x8d6   : > { %3438 = vmatmul.mubr.bf16.vlgmr.msra.gmra.mxu0 %v2566_v33 }
 0x8d8   : > { %v3419_v29 = vpop.f32.mrf.mxu1 }
 0x8d9   : > { %v4845_v39 = vsub.f32 %v3153_v13, %v3419_v29  ;;  %v3782_v13 = vld [vmem:[%s4456_s23] sm:$0xff] }
 0x8da   : > { %v2534_v38 = vpop.f32.mrf.mxu1 }
 0x8db   : > { %v4841_v30 = vsub.f32 %v3147_v47, %v2534_v38  ;;  %v2563_v45 = vmul.f32 %v4845_v39, %v4845_v39 }
 0x8dc   : > { %v3420_v34 = vpop.f32.mrf.mxu1 }
 0x8dd   : > { %v4843_v35 = vsub.f32 %v3156_v14, %v3420_v34  ;;  %v2561_v43 = vmul.f32 %v4841_v30, %v4841_v30  ;;  %v3785_v34 = vld [vmem:[%s4456_s23 + $0x30] sm:$0xff] }
 0x8de   : > { %v2537_v40 = vpop.f32.mrf.mxu1 }
 0x8df   : > { %v4847_v41 = vsub.f32 %v3150_v7, %v2537_v40  ;;  %v2564_v18 = vmul.f32 %v4843_v35, %v4843_v35  ;;  %v3781_v7 = vld [vmem:[%s4456_s23 + $0x10] sm:$0xff] }
 0x8e1   : > { %v2562_v44 = vmul.f32 %v4847_v41, %v4847_v41  ;;  %v2568_v48 = vpack.c.bf16 %v2564_v18, %v2563_v45 }
 0x8e3   : > { %v2567_v31 = vpack.c.bf16 %v2562_v44, %v2561_v43 }
 0x8e5   : > { %3441 = vmatprep.mubr.bf16.mxu0 %v2567_v31 }
 0x8e6   : > { %3442 = vmatmul.mubr.bf16.gmra.mxu0 %v2568_v48 }
 0x996   : > { %v3439_v49 = vpop.f32.mrf.mxu0 }
 0x997   : > { %v2612_v50 = vadd.f32 1e-05, %v3439_v49 }
 0x998   : > { %v2603_v46 = vpop.f32.mrf.mxu0 }
 0x999   : > { %3765 = vrsqrt.f32 %v2612_v50  ;;  %v2604_v51 = vadd.f32 1e-05, %v2603_v46 }
 0x99a   : > { %v3440_v52 = vpop.f32.mrf.mxu0 }
 0x99b   : > { %3767 = vrsqrt.f32 %v2604_v51  ;;  %v2615_v36 = vadd.f32 1e-05, %v3440_v52 }
 0x99c   : > { %v2606_v53 = vpop.f32.mrf.mxu0 }
 0x99d   : > { %3769 = vrsqrt.f32 %v2615_v36  ;;  %v2607_v54 = vadd.f32 1e-05, %v2606_v53 }
 0x99f   : > { %3771 = vrsqrt.f32 %v2607_v54 }
 0x9a6   : > { %v3766_v0 = vpop.eup %3765  ;;  %v3443_v15 = vpop.f32.mrf.mxu0 }
 0x9a7   : > { %v2644_v5 = vmul.f32 %v3766_v0, %v2551_v37  ;;  %v2628_v6 = vadd.f32 1e-05, %v3443_v15 }
 0x9a8   : > { %v3768_v62 = vpop.eup %3767  ;;  %v2619_v61 = vpop.f32.mrf.mxu0 }
 0x9a9   : > { %v2658_v1 = vmul.f32 %v3000_v56, %v2644_v5  ;;  %v2642_v63 = vmul.f32 %v3768_v62, %v2549_v23  ;;  %3773 = vrsqrt.f32 %v2628_v6  ;;  %v2620_v19 = vadd.f32 1e-05, %v2619_v61 }
 0x9aa   : > { %v3770_v58 = vpop.eup %3769  ;;  %v3444_v2 = vpop.f32.mrf.mxu0 }
 0x9ab   : > { %v2672_v4 = vadd.f32 %v3001_v55, %v2658_v1  ;;  %v2656_v57 = vmul.f32 %v3000_v56, %v2642_v63  ;;  %v2645_v16 = vmul.f32 %v3770_v58, %v2552_v24  ;;  %3775 = vrsqrt.f32 %v2620_v19  ;;  %v3784_v24 = vld [vmem:[%s4456_s23 + $0x8] sm:$0xff] }
 0x9ac   : > { %v3772_v3 = vpop.eup %3771  ;;  %v2631_v59 = vadd.f32 1e-05, %v3444_v2  ;;  %v2622_v47 = vpop.f32.mrf.mxu0 }
 0x9ad   : > { %v2680_v8 = vadd.f32 %v3781_v7, %v2672_v4  ;;  %v2670_v17 = vadd.f32 %v3001_v55, %v2656_v57  ;;  %v2659_v9 = vmul.f32 %v3000_v56, %v2645_v16  ;;  %v2643_v10 = vmul.f32 %v3772_v3, %v2550_v25 }
 0x9ae   : > { %3777 = vrsqrt.f32 %v2631_v59  ;;  %v2623_v12 = vadd.f32 1e-05, %v2622_v47 }
 0x9af   : > { %2688 = vst [vmem:[%s4866_s1 + $0x10] sm:$0xff] %v2680_v8  ;;  %v2678_v14 = vadd.f32 %v3782_v13, %v2670_v17  ;;  %v2673_v20 = vadd.f32 %v3001_v55, %v2659_v9  ;;  %v2657_v21 = vmul.f32 %v3000_v56, %v2643_v10 }
 0x9b0   : > { %3779 = vrsqrt.f32 %v2623_v12 }
 0x9b1   : > { %2686 = vst [vmem:[%s4866_s1] sm:$0xff] %v2678_v14  ;;  %v2681_v42 = vadd.f32 %v3783_v11, %v2673_v20  ;;  %v2671_v23 = vadd.f32 %v3001_v55, %v2657_v21 }
 0x9b3   : > { %2689 = vst [vmem:[%s4866_s1 + $0x18] sm:$0xff] %v2681_v42  ;;  %v2679_v37 = vadd.f32 %v3784_v24, %v2671_v23 }
 0x9b5   : > { %2687 = vst [vmem:[%s4866_s1 + $0x8] sm:$0xff] %v2679_v37 }
 0x9b6   : > { %v3774_v22 = vpop.eup %3773 }
 0x9b7   : > { %v2648_v25 = vmul.f32 %v3774_v22, %v4845_v39 }
 0x9b8   : > { %v3776_v26 = vpop.eup %3775 }
 0x9b9   : > { %v2662_v27 = vmul.f32 %v3000_v56, %v2648_v25  ;;  %v2646_v60 = vmul.f32 %v3776_v26, %v4841_v30  ;;  %v3786_v30 = vld [vmem:[%s4456_s23 + $0x20] sm:$0xff] }
 0x9bb   : > { %v3778_v28 = vpop.eup %3777  ;;  %v2676_v32 = vadd.f32 %v3001_v55, %v2662_v27  ;;  %v2660_v33 = vmul.f32 %v3000_v56, %v2646_v60 }
 0x9bc   : > { %v2649_v29 = vmul.f32 %v3778_v28, %v4843_v35  ;;  %v3787_v35 = vld [vmem:[%s4456_s23 + $0x38] sm:$0xff] }
 0x9bd   : > { %v3780_v38 = vpop.eup %3779  ;;  %v2684_v40 = vadd.f32 %v3785_v34, %v2676_v32  ;;  %v2674_v18 = vadd.f32 %v3001_v55, %v2660_v33 }
 0x9be   : > { %v2663_v43 = vmul.f32 %v3000_v56, %v2649_v29  ;;  %v2647_v39 = vmul.f32 %v3780_v38, %v4847_v41  ;;  %v3788_v41 = vld [vmem:[%s4456_s23 + $0x28] sm:$0xff] }
 0x9bf   : > { %2692 = vst [vmem:[%s4866_s1 + $0x30] sm:$0xff] %v2684_v40  ;;  %v2682_v44 = vadd.f32 %v3786_v30, %v2674_v18 }
 0x9c0   : > { %v2677_v45 = vadd.f32 %v3001_v55, %v2663_v43  ;;  %v2661_v31 = vmul.f32 %v3000_v56, %v2647_v39 }
 0x9c1   : > { %2690 = vst [vmem:[%s4866_s1 + $0x20] sm:$0xff] %v2682_v44 }
 0x9c2   : > { %v2685_v48 = vadd.f32 %v3787_v35, %v2677_v45  ;;  %v2675_v49 = vadd.f32 %v3001_v55, %v2661_v31 }
 0x9c4   : > { %2693 = vst [vmem:[%s4866_s1 + $0x38] sm:$0xff] %v2685_v48  ;;  %v2683_v50 = vadd.f32 %v3788_v41, %v2675_v49 }
 0x9c6   : > { %2691 = vst [vmem:[%s4866_s1 + $0x28] sm:$0xff] %v2683_v50 }
 0x9c7   : > { %4064 = shalt.err (!%p4061_p5)
}
 0x9c8   : > { %s4065_s23 = scalar_lea.hbm %s4889_s9, 1024  ;;  %s4069_s25 = scalar_lea.hbm %s5007_s8, 2048 }
 0x9c9   : > { %p4066_p7 = scmp.ne.s32.totalorder %s4889_s9, %s4065_s23  ;;  %p4070_p12 = scmp.lt.s32.totalorder %s4889_s9, %s5007_s8 }
 0x9ca   : > { %p4071_p2 = scmp.lt.s32.totalorder %s4069_s25, %s4065_s23 }
 0x9cb   : > { %p4067_p10 = pnand %p4066_p7, %p5008_p9 }
 0x9cc   : > { %p4072_p13 = por %p4071_p2, %p4070_p12 }
 0x9cd   : > { %p4068_p11 = pneg %p4067_p10 }
 0x9cf   : > { %p4073_p8 = pnand %p4072_p13, %p4068_p11 }
 0x9d1   : > { %4076 = shalt.err (!%p4073_p8)
}
 0x9d2   : > { %s4153_s27 = smov 128   ;;  %s4154_s3 = smov 8  }
 0x9d3   : > { %3483 = dma.vmem_to_hbm [thread:$0]  (%p5008_p9), %s4891_s17, 1024, %s4889_s9, %s2695_s19, %s4153_s27, %s4153_s27, %s4154_s3  }
 0x9d4 PF: > { %s2723_s28 = sand.u32 1, %s4123_s29   ;;  %p5009_p1 = scmp.ne.s32.totalorder %s4993_s22, 0 }
 0x9d5   : > { %p5010_p3 = scmp.ge.s32.totalorder %s4135_s16, 2  ;;  %s2724_s5 = scalar_lea.sflag [#allocation4], %s2723_s28 }
 0x9d7   : > { %p3518_p4 = pnand %p5010_p3, %p5009_p1 }
 0x9d9   : > { %p3519_p0 = pneg %p3518_p4 }
 0x9db   : > { %4118 = dma.done.wait (%p3519_p0), %s2724_s5, 1024  }
 0x9dc   : > { %4120 = vsyncadd (%p3519_p0), %s2724_s5, 4294966272  ;;  %p32_p6 = scmp.ge.s32.totalorder %s4381_s26, 4   ;;  %s5011_s29 = smov %s4127_s30 }
 0x9dd   : > { %s5012_s30 = smov %s4131_s15  ;;  %s5013_s15 = smov %s4393_s21 }
 0x9de   : > { %s5014_s16 = smov %s4381_s26  ;;  %34 = sbr.rel (!%p32_p6) target bundleno = 21 (0x15), region = 157 }
 0x9e3   :  { %2729 = vsyncpa [#allocation3], 1 }
 0x9e4   :  { %2731 = vsyncpa [#allocation3 + $0x1], 1 }
 0x9e5   :  { %2732 = vsyncpa [#allocation6], 1 }
 0x9e6   :  { %2733 = vsyncpa [#allocation9], 1 }
 0x9e7   :  { %2734 = vsyncpa [#allocation12], 1 }
 0x9e8   :  { %2735 = vsyncpa [#allocation15], 1 }
 0x9e9   :  { %2736 = vsyncpa [#allocation18], 1 }
 0x9ea   :  { %2737 = vsyncpa [#allocation4], 1 }
 0x9eb   :  { %2739 = vsyncpa [#allocation4 + $0x1], 1 }

</bundles_post_ra>
